<compile_context>
chip_gen: v7x
topology: tpu7x:2x2x1
jax: 0.10.0
libtpu: 0.0.40
codegen_flags: <defaults>
</compile_context>

<pallas_src>
import functools

import jax
import jax.numpy as jnp
import numpy as np
from jax import lax
from jax.experimental import pallas as pl
from jax.experimental.pallas import tpu as pltpu


# ---------------------------------------------------------------------------
# Pallas kernel: one image per grid step (grid = (N,), "parallel").
#   xs_ref : (1, s*s, Hh, Wh, Cin)  polyphase-split, zero-padded NHWC input
#   wdw_ref: (3, 3, Cin)            depthwise 3x3 weights (per channel)
#   s1/b1  : (1, Cin)               folded BN1 scale / bias (conv bias incl.)
#   wpw_ref: (Cin, Cout) bf16       pointwise 1x1 weights
#   s2/b2  : (1, Cout)              folded BN2 scale / bias (conv bias incl.)
#   o_ref  : (1, Ho, Wo, Cout)      NHWC output tile
# ---------------------------------------------------------------------------
def _mobile_block_kernel(xs_ref, wdw_ref, s1_ref, b1_ref, wpw_ref, s2_ref,
                         b2_ref, o_ref, *, stride, ho, wo):
    s = stride
    cin = xs_ref.shape[-1]
    cout = o_ref.shape[-1]
    wdw = wdw_ref[...]                      # (3, 3, Cin)

    # Depthwise 3x3: 9 taps, each a contiguous window of one polyphase plane
    # (no strided slices, even for stride 2).  VPU MACs in f32.
    acc = jnp.zeros((ho, wo, cin), jnp.float32)
    for dy in range(3):
        for dx in range(3):
            p = (dy % s) * s + (dx % s)     # which polyphase plane
            oy, ox = dy // s, dx // s       # offset inside that plane
            win = xs_ref[0, p, oy:oy + ho, ox:ox + wo, :]
            acc = acc + win.astype(jnp.float32) * wdw[dy, dx]

    # Folded BN1 + ReLU (kept in f32 on the VPU, incl. on v5e).
    h1 = jnp.maximum(acc * s1_ref[...] + b1_ref[...], 0.0)

    # Pointwise 1x1 conv as a flat (M=Ho*Wo, K=Cin, N=Cout) MXU matmul,
    # bf16 inputs, f32 accumulate.
    if wo % 8 == 0:
        h1_2d = h1.reshape(ho * wo, cin).astype(jnp.bfloat16)
        h2 = jnp.dot(h1_2d, wpw_ref[...], preferred_element_type=jnp.float32)
        h2 = jnp.maximum(h2 * s2_ref[...] + b2_ref[...], 0.0)
        o_ref[0] = h2.reshape(ho, wo, cout).astype(o_ref.dtype)
    else:
        # Fallback when the leading-dim merge would straddle sublane tiles.
        h2 = jnp.einsum("hwc,cd->hwd", h1.astype(jnp.bfloat16), wpw_ref[...],
                        preferred_element_type=jnp.float32)
        h2 = jnp.maximum(h2 * s2_ref[...] + b2_ref[...], 0.0)
        o_ref[0] = h2.astype(o_ref.dtype)


# ---------------------------------------------------------------------------
# Wrapper: NCHW -> NHWC, pad + polyphase split, fold BN, launch over batch.
# ---------------------------------------------------------------------------
def mobile_block(x_nchw, params, *, stride_dw=1, pad_dw=1, stride_pw=1):
    (w_dw, b_dw, g1, be1, m1, v1, w_pw, b_pw, g2, be2, m2, v2) = params
    eps = 1e-5
    s = int(stride_dw)

    n, cin, h, w = x_nchw.shape
    cout = w_pw.shape[0]
    ho = (h + 2 * pad_dw - 3) // s + 1
    wo = (w + 2 * pad_dw - 3) // s + 1

    # NCHW -> NHWC, zero-pad, then polyphase(stride) split so that every
    # depthwise tap in the kernel is a contiguous window.  For stride 1 the
    # reshape/transpose chain is a no-op; for stride 2 XLA fuses it with the
    # pad/transpose into a single relayout pass.
    x_nhwc = jnp.transpose(x_nchw, (0, 2, 3, 1))
    hpe = pl.cdiv(h + 2 * pad_dw, s) * s
    wpe = pl.cdiv(w + 2 * pad_dw, s) * s
    xp = jnp.pad(x_nhwc, ((0, 0),
                          (pad_dw, hpe - h - pad_dw),
                          (pad_dw, wpe - w - pad_dw),
                          (0, 0)))
    hh, wh = hpe // s, wpe // s
    xs = (xp.reshape(n, hh, s, wh, s, cin)
            .transpose(0, 2, 4, 1, 3, 5)
            .reshape(n, s * s, hh, wh, cin))

    # Weight re-layouts for the NHWC kernel (pointwise weights in bf16 for MXU).
    wdw_hwc = jnp.transpose(w_dw[:, 0], (1, 2, 0))                 # (3, 3, Cin)
    wpw_cd = jnp.transpose(w_pw[:, :, 0, 0], (1, 0)).astype(jnp.bfloat16)

    # Fold BatchNorm (inference) + conv bias into per-channel scale / bias.
    s1 = g1 / jnp.sqrt(v1 + eps)
    b1 = be1 + s1 * (b_dw - m1)
    s2 = g2 / jnp.sqrt(v2 + eps)
    b2 = be2 + s2 * (b_pw - m2)
    s1, b1 = s1.reshape(1, cin), b1.reshape(1, cin)
    s2, b2 = s2.reshape(1, cout), b2.reshape(1, cout)

    kernel = functools.partial(_mobile_block_kernel, stride=s, ho=ho, wo=wo)

    itemsize = jnp.dtype(x_nchw.dtype).itemsize
    flops = 2 * n * ho * wo * cin * (9 + cout)
    bytes_accessed = int(xs.size * itemsize + n * ho * wo * cout * itemsize
                         + wdw_hwc.size * 4 + wpw_cd.size * 2
                         + 2 * (cin + cout) * 4)

    out_nhwc = pl.pallas_call(
        kernel,
        out_shape=jax.ShapeDtypeStruct((n, ho, wo, cout), x_nchw.dtype),
        grid=(n,),
        in_specs=[
            pl.BlockSpec((1, s * s, hh, wh, cin), lambda i: (i, 0, 0, 0, 0)),
            pl.BlockSpec((3, 3, cin), lambda i: (0, 0, 0)),
            pl.BlockSpec((1, cin), lambda i: (0, 0)),
            pl.BlockSpec((1, cin), lambda i: (0, 0)),
            pl.BlockSpec((cin, cout), lambda i: (0, 0)),
            pl.BlockSpec((1, cout), lambda i: (0, 0)),
            pl.BlockSpec((1, cout), lambda i: (0, 0)),
        ],
        out_specs=pl.BlockSpec((1, ho, wo, cout), lambda i: (i, 0, 0, 0)),
        compiler_params=pltpu.CompilerParams(
            dimension_semantics=("parallel",),
            vmem_limit_bytes=32 * 1024 * 1024),
        cost_estimate=pl.CostEstimate(flops=flops, transcendentals=0,
                                      bytes_accessed=bytes_accessed),
    )(xs, wdw_hwc, s1, b1, wpw_cd, s2, b2)

    if stride_pw != 1:
        # 1x1 conv with stride == decimation of the stride-1 output.
        out_nhwc = out_nhwc[:, ::stride_pw, ::stride_pw, :]
    # TODO(synk): padding_pw != 0 on the 1x1 pointwise conv is not supported.

    return jnp.transpose(out_nhwc, (0, 3, 1, 2))  # back to NCHW


# ---------------------------------------------------------------------------
# Pure-JAX reference (exact PyTorch semantics, NCHW) for validation.
# ---------------------------------------------------------------------------
def mobile_block_ref(x, params, *, stride_dw=1, pad_dw=1):
    (w_dw, b_dw, g1, be1, m1, v1, w_pw, b_pw, g2, be2, m2, v2) = params
    eps = 1e-5
    cin = x.shape[1]
    y = lax.conv_general_dilated(
        x, w_dw, window_strides=(stride_dw, stride_dw),
        padding=((pad_dw, pad_dw), (pad_dw, pad_dw)),
        feature_group_count=cin,
        dimension_numbers=("NCHW", "OIHW", "NCHW"))
    y = y + b_dw[None, :, None, None]
    y = (y - m1[None, :, None, None]) / jnp.sqrt(v1 + eps)[None, :, None, None]
    y = y * g1[None, :, None, None] + be1[None, :, None, None]
    y = jnp.maximum(y, 0.0)
    z = lax.conv_general_dilated(
        y, w_pw, window_strides=(1, 1), padding=((0, 0), (0, 0)),
        dimension_numbers=("NCHW", "OIHW", "NCHW"))
    z = z + b_pw[None, :, None, None]
    z = (z - m2[None, :, None, None]) / jnp.sqrt(v2 + eps)[None, :, None, None]
    z = z * g2[None, :, None, None] + be2[None, :, None, None]
    return jnp.maximum(z, 0.0)


if __name__ == "__main__":
    key = jax.random.PRNGKey(0)
    ks = jax.random.split(key, 12)

    # Small but MobileNet-realistic shapes (first depthwise-separable block).
    N, CIN, COUT, H, W = 4, 32, 64, 16, 16

    x = jax.random.normal(ks[0], (N, CIN, H, W), jnp.float32)

    # Deterministic synthetic parameters (PyTorch shapes).
    w_dw = 0.2 * jax.random.normal(ks[1], (CIN, 1, 3, 3), jnp.float32)
    b_dw = 0.1 * jax.random.normal(ks[2], (CIN,), jnp.float32)
    g1 = 1.0 + 0.1 * jax.random.normal(ks[3], (CIN,), jnp.float32)
    be1 = 0.1 * jax.random.normal(ks[4], (CIN,), jnp.float32)
    m1 = 0.05 * jax.random.normal(ks[5], (CIN,), jnp.float32)
    v1 = 1.0 + 0.1 * jax.random.uniform(ks[6], (CIN,), jnp.float32)

    w_pw = 0.2 * jax.random.normal(ks[7], (COUT, CIN, 1, 1), jnp.float32)
    b_pw = 0.1 * jax.random.normal(ks[8], (COUT,), jnp.float32)
    g2 = 1.0 + 0.1 * jax.random.normal(ks[9], (COUT,), jnp.float32)
    be2 = 0.1 * jax.random.normal(ks[10], (COUT,), jnp.float32)
    m2 = 0.05 * jax.random.normal(ks[11], (COUT,), jnp.float32)
    v2 = 1.0 + 0.1 * jax.random.uniform(ks[11], (COUT,), jnp.float32)

    params = (w_dw, b_dw, g1, be1, m1, v1, w_pw, b_pw, g2, be2, m2, v2)

    # Exercise both the stride-1 and stride-2 depthwise paths.
    for stride in (1, 2):
        out = jax.block_until_ready(mobile_block(x, params, stride_dw=stride))
        ref = mobile_block_ref(x, params, stride_dw=stride)
        # bf16 MXU inputs for the pointwise matmul -> bf16-level tolerance.
        np.testing.assert_allclose(np.asarray(out), np.asarray(ref),
                                   rtol=2e-2, atol=2e-2)

    print("KERNEL_OK")
</pallas_src>

<mosaic_0001>
module attributes {stable_mosaic.version = 11 : i64} {
  func.func @_mobile_block_kernel(%arg0: i32, %arg1: memref<1x1x18x18x32xf32, #tpu.memory_space<vmem>>, %arg2: memref<3x3x32xf32, #tpu.memory_space<vmem>>, %arg3: memref<1x32xf32, #tpu.memory_space<vmem>>, %arg4: memref<1x32xf32, #tpu.memory_space<vmem>>, %arg5: memref<32x64xbf16, #tpu.memory_space<vmem>>, %arg6: memref<1x64xf32, #tpu.memory_space<vmem>>, %arg7: memref<1x64xf32, #tpu.memory_space<vmem>>, %arg8: memref<1x16x16x64xf32, #tpu.memory_space<vmem>>) attributes {dimension_semantics = [#tpu.dimension_semantics<parallel>], iteration_bounds = array<i64: 4>, scalar_prefetch = 0 : i64, scratch_operands = 0 : i64, tpu.core_type = #tpu.core_type<tc>, window_params = [{transform_indices = @transform_0, window_bounds = array<i64: 1, 1, 18, 18, 32>}, {pipeline_mode = #tpu.pipeline_mode<synchronous>, transform_indices = @transform_1, window_bounds = array<i64: 3, 3, 32>}, {pipeline_mode = #tpu.pipeline_mode<synchronous>, transform_indices = @transform_2, window_bounds = array<i64: 1, 32>}, {pipeline_mode = #tpu.pipeline_mode<synchronous>, transform_indices = @transform_3, window_bounds = array<i64: 1, 32>}, {pipeline_mode = #tpu.pipeline_mode<synchronous>, transform_indices = @transform_4, window_bounds = array<i64: 32, 64>}, {pipeline_mode = #tpu.pipeline_mode<synchronous>, transform_indices = @transform_5, window_bounds = array<i64: 1, 64>}, {pipeline_mode = #tpu.pipeline_mode<synchronous>, transform_indices = @transform_6, window_bounds = array<i64: 1, 64>}, {transform_indices = @transform_7, window_bounds = array<i64: 1, 16, 16, 64>}]} {
    %c0 = arith.constant 0 : index
    %c0_0 = arith.constant 0 : index
    %c0_1 = arith.constant 0 : index
    %0 = vector.load %arg2[%c0, %c0_0, %c0_1] : memref<3x3x32xf32, #tpu.memory_space<vmem>>, vector<3x3x32xf32>
    %cst = arith.constant 0.000000e+00 : f32
    %1 = vector.broadcast %cst : f32 to vector<16x16x32xf32>
    %c0_2 = arith.constant 0 : index
    %c0_3 = arith.constant 0 : index
    %c0_4 = arith.constant 0 : index
    %c0_5 = arith.constant 0 : index
    %c0_6 = arith.constant 0 : index
    %2 = vector.load %arg1[%c0_2, %c0_3, %c0_4, %c0_5, %c0_6] : memref<1x1x18x18x32xf32, #tpu.memory_space<vmem>>, vector<1x1x16x16x32xf32>
    %3 = vector.shape_cast %2 : vector<1x1x16x16x32xf32> to vector<16x16x32xf32>
    %4 = vector.extract_strided_slice %0 {offsets = [0, 0, 0], sizes = [1, 1, 32], strides = [1, 1, 1]} : vector<3x3x32xf32> to vector<1x1x32xf32>
    %5 = vector.shape_cast %4 : vector<1x1x32xf32> to vector<32xf32>
    %6 = vector.shape_cast %5 : vector<32xf32> to vector<1x1x32xf32>
    %7 = vector.broadcast %6 : vector<1x1x32xf32> to vector<16x16x32xf32>
    %8 = arith.mulf %3, %7 : vector<16x16x32xf32>
    %9 = arith.addf %1, %8 : vector<16x16x32xf32>
    %c0_7 = arith.constant 0 : index
    %c0_8 = arith.constant 0 : index
    %c0_9 = arith.constant 0 : index
    %c1 = arith.constant 1 : index
    %c0_10 = arith.constant 0 : index
    %10 = vector.load %arg1[%c0_7, %c0_8, %c0_9, %c1, %c0_10] : memref<1x1x18x18x32xf32, #tpu.memory_space<vmem>>, vector<1x1x16x16x32xf32>
    %11 = vector.shape_cast %10 : vector<1x1x16x16x32xf32> to vector<16x16x32xf32>
    %12 = vector.extract_strided_slice %0 {offsets = [0, 1, 0], sizes = [1, 1, 32], strides = [1, 1, 1]} : vector<3x3x32xf32> to vector<1x1x32xf32>
    %13 = vector.shape_cast %12 : vector<1x1x32xf32> to vector<32xf32>
    %14 = vector.shape_cast %13 : vector<32xf32> to vector<1x1x32xf32>
    %15 = vector.broadcast %14 : vector<1x1x32xf32> to vector<16x16x32xf32>
    %16 = arith.mulf %11, %15 : vector<16x16x32xf32>
    %17 = arith.addf %9, %16 : vector<16x16x32xf32>
    %c0_11 = arith.constant 0 : index
    %c0_12 = arith.constant 0 : index
    %c0_13 = arith.constant 0 : index
    %c2 = arith.constant 2 : index
    %c0_14 = arith.constant 0 : index
    %18 = vector.load %arg1[%c0_11, %c0_12, %c0_13, %c2, %c0_14] : memref<1x1x18x18x32xf32, #tpu.memory_space<vmem>>, vector<1x1x16x16x32xf32>
    %19 = vector.shape_cast %18 : vector<1x1x16x16x32xf32> to vector<16x16x32xf32>
    %20 = vector.extract_strided_slice %0 {offsets = [0, 2, 0], sizes = [1, 1, 32], strides = [1, 1, 1]} : vector<3x3x32xf32> to vector<1x1x32xf32>
    %21 = vector.shape_cast %20 : vector<1x1x32xf32> to vector<32xf32>
    %22 = vector.shape_cast %21 : vector<32xf32> to vector<1x1x32xf32>
    %23 = vector.broadcast %22 : vector<1x1x32xf32> to vector<16x16x32xf32>
    %24 = arith.mulf %19, %23 : vector<16x16x32xf32>
    %25 = arith.addf %17, %24 : vector<16x16x32xf32>
    %c0_15 = arith.constant 0 : index
    %c0_16 = arith.constant 0 : index
    %c1_17 = arith.constant 1 : index
    %c0_18 = arith.constant 0 : index
    %c0_19 = arith.constant 0 : index
    %26 = vector.load %arg1[%c0_15, %c0_16, %c1_17, %c0_18, %c0_19] : memref<1x1x18x18x32xf32, #tpu.memory_space<vmem>>, vector<1x1x16x16x32xf32>
    %27 = vector.shape_cast %26 : vector<1x1x16x16x32xf32> to vector<16x16x32xf32>
    %28 = vector.extract_strided_slice %0 {offsets = [1, 0, 0], sizes = [1, 1, 32], strides = [1, 1, 1]} : vector<3x3x32xf32> to vector<1x1x32xf32>
    %29 = vector.shape_cast %28 : vector<1x1x32xf32> to vector<32xf32>
    %30 = vector.shape_cast %29 : vector<32xf32> to vector<1x1x32xf32>
    %31 = vector.broadcast %30 : vector<1x1x32xf32> to vector<16x16x32xf32>
    %32 = arith.mulf %27, %31 : vector<16x16x32xf32>
    %33 = arith.addf %25, %32 : vector<16x16x32xf32>
    %c0_20 = arith.constant 0 : index
    %c0_21 = arith.constant 0 : index
    %c1_22 = arith.constant 1 : index
    %c1_23 = arith.constant 1 : index
    %c0_24 = arith.constant 0 : index
    %34 = vector.load %arg1[%c0_20, %c0_21, %c1_22, %c1_23, %c0_24] : memref<1x1x18x18x32xf32, #tpu.memory_space<vmem>>, vector<1x1x16x16x32xf32>
    %35 = vector.shape_cast %34 : vector<1x1x16x16x32xf32> to vector<16x16x32xf32>
    %36 = vector.extract_strided_slice %0 {offsets = [1, 1, 0], sizes = [1, 1, 32], strides = [1, 1, 1]} : vector<3x3x32xf32> to vector<1x1x32xf32>
    %37 = vector.shape_cast %36 : vector<1x1x32xf32> to vector<32xf32>
    %38 = vector.shape_cast %37 : vector<32xf32> to vector<1x1x32xf32>
    %39 = vector.broadcast %38 : vector<1x1x32xf32> to vector<16x16x32xf32>
    %40 = arith.mulf %35, %39 : vector<16x16x32xf32>
    %41 = arith.addf %33, %40 : vector<16x16x32xf32>
    %c0_25 = arith.constant 0 : index
    %c0_26 = arith.constant 0 : index
    %c1_27 = arith.constant 1 : index
    %c2_28 = arith.constant 2 : index
    %c0_29 = arith.constant 0 : index
    %42 = vector.load %arg1[%c0_25, %c0_26, %c1_27, %c2_28, %c0_29] : memref<1x1x18x18x32xf32, #tpu.memory_space<vmem>>, vector<1x1x16x16x32xf32>
    %43 = vector.shape_cast %42 : vector<1x1x16x16x32xf32> to vector<16x16x32xf32>
    %44 = vector.extract_strided_slice %0 {offsets = [1, 2, 0], sizes = [1, 1, 32], strides = [1, 1, 1]} : vector<3x3x32xf32> to vector<1x1x32xf32>
    %45 = vector.shape_cast %44 : vector<1x1x32xf32> to vector<32xf32>
    %46 = vector.shape_cast %45 : vector<32xf32> to vector<1x1x32xf32>
    %47 = vector.broadcast %46 : vector<1x1x32xf32> to vector<16x16x32xf32>
    %48 = arith.mulf %43, %47 : vector<16x16x32xf32>
    %49 = arith.addf %41, %48 : vector<16x16x32xf32>
    %c0_30 = arith.constant 0 : index
    %c0_31 = arith.constant 0 : index
    %c2_32 = arith.constant 2 : index
    %c0_33 = arith.constant 0 : index
    %c0_34 = arith.constant 0 : index
    %50 = vector.load %arg1[%c0_30, %c0_31, %c2_32, %c0_33, %c0_34] : memref<1x1x18x18x32xf32, #tpu.memory_space<vmem>>, vector<1x1x16x16x32xf32>
    %51 = vector.shape_cast %50 : vector<1x1x16x16x32xf32> to vector<16x16x32xf32>
    %52 = vector.extract_strided_slice %0 {offsets = [2, 0, 0], sizes = [1, 1, 32], strides = [1, 1, 1]} : vector<3x3x32xf32> to vector<1x1x32xf32>
    %53 = vector.shape_cast %52 : vector<1x1x32xf32> to vector<32xf32>
    %54 = vector.shape_cast %53 : vector<32xf32> to vector<1x1x32xf32>
    %55 = vector.broadcast %54 : vector<1x1x32xf32> to vector<16x16x32xf32>
    %56 = arith.mulf %51, %55 : vector<16x16x32xf32>
    %57 = arith.addf %49, %56 : vector<16x16x32xf32>
    %c0_35 = arith.constant 0 : index
    %c0_36 = arith.constant 0 : index
    %c2_37 = arith.constant 2 : index
    %c1_38 = arith.constant 1 : index
    %c0_39 = arith.constant 0 : index
    %58 = vector.load %arg1[%c0_35, %c0_36, %c2_37, %c1_38, %c0_39] : memref<1x1x18x18x32xf32, #tpu.memory_space<vmem>>, vector<1x1x16x16x32xf32>
    %59 = vector.shape_cast %58 : vector<1x1x16x16x32xf32> to vector<16x16x32xf32>
    %60 = vector.extract_strided_slice %0 {offsets = [2, 1, 0], sizes = [1, 1, 32], strides = [1, 1, 1]} : vector<3x3x32xf32> to vector<1x1x32xf32>
    %61 = vector.shape_cast %60 : vector<1x1x32xf32> to vector<32xf32>
    %62 = vector.shape_cast %61 : vector<32xf32> to vector<1x1x32xf32>
    %63 = vector.broadcast %62 : vector<1x1x32xf32> to vector<16x16x32xf32>
    %64 = arith.mulf %59, %63 : vector<16x16x32xf32>
    %65 = arith.addf %57, %64 : vector<16x16x32xf32>
    %c0_40 = arith.constant 0 : index
    %c0_41 = arith.constant 0 : index
    %c2_42 = arith.constant 2 : index
    %c2_43 = arith.constant 2 : index
    %c0_44 = arith.constant 0 : index
    %66 = vector.load %arg1[%c0_40, %c0_41, %c2_42, %c2_43, %c0_44] : memref<1x1x18x18x32xf32, #tpu.memory_space<vmem>>, vector<1x1x16x16x32xf32>
    %67 = vector.shape_cast %66 : vector<1x1x16x16x32xf32> to vector<16x16x32xf32>
    %68 = vector.extract_strided_slice %0 {offsets = [2, 2, 0], sizes = [1, 1, 32], strides = [1, 1, 1]} : vector<3x3x32xf32> to vector<1x1x32xf32>
    %69 = vector.shape_cast %68 : vector<1x1x32xf32> to vector<32xf32>
    %70 = vector.shape_cast %69 : vector<32xf32> to vector<1x1x32xf32>
    %71 = vector.broadcast %70 : vector<1x1x32xf32> to vector<16x16x32xf32>
    %72 = arith.mulf %67, %71 : vector<16x16x32xf32>
    %73 = arith.addf %65, %72 : vector<16x16x32xf32>
    %c0_45 = arith.constant 0 : index
    %c0_46 = arith.constant 0 : index
    %74 = vector.load %arg3[%c0_45, %c0_46] : memref<1x32xf32, #tpu.memory_space<vmem>>, vector<1x32xf32>
    %75 = vector.shape_cast %74 : vector<1x32xf32> to vector<1x1x32xf32>
    %76 = vector.broadcast %75 : vector<1x1x32xf32> to vector<16x16x32xf32>
    %77 = arith.mulf %73, %76 : vector<16x16x32xf32>
    %c0_47 = arith.constant 0 : index
    %c0_48 = arith.constant 0 : index
    %78 = vector.load %arg4[%c0_47, %c0_48] : memref<1x32xf32, #tpu.memory_space<vmem>>, vector<1x32xf32>
    %79 = vector.shape_cast %78 : vector<1x32xf32> to vector<1x1x32xf32>
    %80 = vector.broadcast %79 : vector<1x1x32xf32> to vector<16x16x32xf32>
    %81 = arith.addf %77, %80 : vector<16x16x32xf32>
    %cst_49 = arith.constant 0.000000e+00 : f32
    %82 = vector.broadcast %cst_49 : f32 to vector<16x16x32xf32>
    %83 = arith.maximumf %81, %82 : vector<16x16x32xf32>
    %84 = vector.shape_cast %83 : vector<16x16x32xf32> to vector<256x32xf32>
    %85 = arith.truncf %84 : vector<256x32xf32> to vector<256x32xbf16>
    %c0_50 = arith.constant 0 : index
    %c0_51 = arith.constant 0 : index
    %86 = vector.load %arg5[%c0_50, %c0_51] : memref<32x64xbf16, #tpu.memory_space<vmem>>, vector<32x64xbf16>
    %cst_52 = arith.constant dense<0.000000e+00> : vector<256x64xf32>
    %87 = tpu.matmul %85, %86, %cst_52 {dimension_numbers = #tpu.dot_dimension_numbers<[1], [0], [0], [1], [0, 0, 1, 1], [], []>} : vector<256x32xbf16>, vector<32x64xbf16>, vector<256x64xf32> -> vector<256x64xf32>
    %c0_53 = arith.constant 0 : index
    %c0_54 = arith.constant 0 : index
    %88 = vector.load %arg6[%c0_53, %c0_54] : memref<1x64xf32, #tpu.memory_space<vmem>>, vector<1x64xf32>
    %89 = vector.broadcast %88 : vector<1x64xf32> to vector<256x64xf32>
    %90 = arith.mulf %87, %89 : vector<256x64xf32>
    %c0_55 = arith.constant 0 : index
    %c0_56 = arith.constant 0 : index
    %91 = vector.load %arg7[%c0_55, %c0_56] : memref<1x64xf32, #tpu.memory_space<vmem>>, vector<1x64xf32>
    %92 = vector.broadcast %91 : vector<1x64xf32> to vector<256x64xf32>
    %93 = arith.addf %90, %92 : vector<256x64xf32>
    %cst_57 = arith.constant 0.000000e+00 : f32
    %94 = vector.broadcast %cst_57 : f32 to vector<256x64xf32>
    %95 = arith.maximumf %93, %94 : vector<256x64xf32>
    %96 = vector.shape_cast %95 : vector<256x64xf32> to vector<16x16x64xf32>
    %c0_58 = arith.constant 0 : index
    %c0_59 = arith.constant 0 : index
    %c0_60 = arith.constant 0 : index
    %c0_61 = arith.constant 0 : index
    %97 = vector.load %arg8[%c0_58, %c0_59, %c0_60, %c0_61] : memref<1x16x16x64xf32, #tpu.memory_space<vmem>>, vector<1x16x16x64xf32>
    %98 = vector.shape_cast %97 : vector<1x16x16x64xf32> to vector<16x16x64xf32>
    %99 = vector.shape_cast %96 : vector<16x16x64xf32> to vector<1x16x16x64xf32>
    tpu.vector_store %arg8[%c0_58, %c0_59, %c0_60, %c0_61], %99 {strides = array<i32>} : memref<1x16x16x64xf32, #tpu.memory_space<vmem>>, vector<1x16x16x64xf32>,
    return
  }
  func.func @transform_0(%arg0: i32) -> (i32, i32, i32, i32, i32) {
    %c0_i32 = arith.constant 0 : i32
    %c0_i32_0 = arith.constant 0 : i32
    %c0_i32_1 = arith.constant 0 : i32
    %c0_i32_2 = arith.constant 0 : i32
    %c0_i32_3 = arith.constant 0 : i32
    return %arg0, %c0_i32, %c0_i32_0, %c0_i32_1, %c0_i32_2 : i32, i32, i32, i32, i32
  }
  func.func @transform_1(%arg0: i32) -> (i32, i32, i32) {
    %c0_i32 = arith.constant 0 : i32
    %c0_i32_0 = arith.constant 0 : i32
    %c0_i32_1 = arith.constant 0 : i32
    %c0_i32_2 = arith.constant 0 : i32
    return %c0_i32, %c0_i32_0, %c0_i32_1 : i32, i32, i32
  }
  func.func @transform_2(%arg0: i32) -> (i32, i32) {
    %c0_i32 = arith.constant 0 : i32
    %c0_i32_0 = arith.constant 0 : i32
    %c0_i32_1 = arith.constant 0 : i32
    return %c0_i32, %c0_i32_0 : i32, i32
  }
  func.func @transform_3(%arg0: i32) -> (i32, i32) {
    %c0_i32 = arith.constant 0 : i32
    %c0_i32_0 = arith.constant 0 : i32
    %c0_i32_1 = arith.constant 0 : i32
    return %c0_i32, %c0_i32_0 : i32, i32
  }
  func.func @transform_4(%arg0: i32) -> (i32, i32) {
    %c0_i32 = arith.constant 0 : i32
    %c0_i32_0 = arith.constant 0 : i32
    %c0_i32_1 = arith.constant 0 : i32
    return %c0_i32, %c0_i32_0 : i32, i32
  }
  func.func @transform_5(%arg0: i32) -> (i32, i32) {
    %c0_i32 = arith.constant 0 : i32
    %c0_i32_0 = arith.constant 0 : i32
    %c0_i32_1 = arith.constant 0 : i32
    return %c0_i32, %c0_i32_0 : i32, i32
  }
  func.func @transform_6(%arg0: i32) -> (i32, i32) {
    %c0_i32 = arith.constant 0 : i32
    %c0_i32_0 = arith.constant 0 : i32
    %c0_i32_1 = arith.constant 0 : i32
    return %c0_i32, %c0_i32_0 : i32, i32
  }
  func.func @transform_7(%arg0: i32) -> (i32, i32, i32, i32) {
    %c0_i32 = arith.constant 0 : i32
    %c0_i32_0 = arith.constant 0 : i32
    %c0_i32_1 = arith.constant 0 : i32
    %c0_i32_2 = arith.constant 0 : i32
    return %arg0, %c0_i32, %c0_i32_0, %c0_i32_1 : i32, i32, i32, i32
  }
}

</mosaic_0001>

<bundles_post_ra>
// kernel: tpu_custom_call.1
= control target key start
LH: loop header
LB: loop body
LE: loop exit
PB: predicated region body
PF: predicated region fallthrough
CT: control target
= control target key end

     0   :  { %12 = vsyncpa [#allocation3], 0  ;;  %s3441_s0 = inlined_call_operand.vmem [shape: f32[4,1,18,18,32], index: 0, kind: input, shape index: {}]   ;;  %s3442_s1 = inlined_call_operand.vmem [shape: f32[3,3,32], index: 1, kind: input, shape index: {}]   ;;  %s3443_s2 = inlined_call_operand.vmem [shape: f32[1,32], index: 2, kind: input, shape index: {}]   ;;  %s3444_s3 = inlined_call_operand.vmem [shape: f32[1,32], index: 3, kind: input, shape index: {}]   ;;  %s3445_s4 = inlined_call_operand.vmem [shape: bf16[32,64], index: 4, kind: input, shape index: {}]   ;;  %s3446_s5 = inlined_call_operand.vmem [shape: f32[1,64], index: 5, kind: input, shape index: {}]   ;;  %s3447_s6 = inlined_call_operand.vmem [shape: f32[1,64], index: 6, kind: input, shape index: {}]   ;;  %s3448_s7 = inlined_call_operand.hbm [shape: f32[4,16,16,64], index: 7, kind: output, shape index: {}]  }
   0x1   :  { %14 = vsyncpa [#allocation3 + $0x1], 0  ;;  %s2191_s24 = smov 0   ;;  %s2193_s25 = smov 0  }
   0x2   :  { %s2195_s26 = smov 0   ;;  %s2197_s27 = smov 0  }
   0x3 LB: > { %s2212_s28 = sadd.s32 4294967295, %s2146_s27   ;;  %s1754_s29 = sadd.s32 4294967294, %s2146_s27   ;;  %s2146_s27 = sphi %s2197_s27, %s3454_s27   ;;  %s2142_s26 = sphi %s2195_s26, %s3453_s26   ;;  %s2138_s25 = sphi %s2193_s25, %s3452_s25   ;;  %s2134_s24 = sphi %s2191_s24, %s3451_s24  }
   0x4   : > { %s2216_s30 = sadd.s32 1, %s2146_s27   ;;  %s179_s8 = sadd.s32 1, %s2142_s26 }
   0x5   : > { %s176_s9 = ssub.s32 %s2146_s27, %s2216_s30  ;;  %p189_p0 = scmp.ne.s32.totalorder %s2142_s26, %s2138_s25 }
   0x6   : > { %p177_p1 = scmp.eq.s32.totalorder %s176_s9, 0  ;;  %p190_p2 = scmp.eq.s32.totalorder %s2212_s28, 3 }
   0x7   : > { %p195_p3 = scmp.ne.s32.totalorder %s2138_s25, %s2134_s24  ;;  %p196_p4 = scmp.eq.s32.totalorder %s1754_s29, 3 }
   0x8   : > { %s2227_s10 = scalar_select %p177_p1, %s2142_s26, %s179_s8  }
   0x9   : > { %p2229_p5 = por %p190_p2, %p189_p0  ;;  %p2233_p6 = por %p196_p4, %p195_p3 }
   0xa   : > { %p1757_p7 = scmp.ge.s32.totalorder %s2146_s27, 1  ;;  %p240_p8 = scmp.lt.s32.totalorder %s2146_s27, 5 }
   0xc   : > { %p241_p9 = pnand %p1757_p7, %p240_p8 }
   0xd   : > { %v2080_v0 = vld [vmem:[%s3445_s4] sm:$0xff] (!%p241_p9)   ;;  %p272_p10 = scmp.lt.s32.totalorder (!%p241_p9), %s2212_s28, 3  ;;  %v313_v1 = vlaneseq (!%p241_p9)  ;;  %v2081_v2 = vld [vmem:[%s3445_s4 + $0x8] sm:$0xff] (!%p241_p9)   ;;  %vm1325_vm0 = vcmask (!%p241_p9), 261120   ;;  %vm1645_vm1 = vcmask (!%p241_p9), 523264   ;;  %s1979_s15 = sshll.u32 (!%p241_p9), %s2212_s28, 12 }
   0xe   : > { %244 = sbr.rel (%p241_p9) target bundleno = 440 (0x1b8), region = 48  ;;  %1998 = vmatprep.subr.bf16.mxu0 (!%p241_p9), %v2080_v0  ;;  %2034 = vmatprep.subr.bf16.mxu1 (!%p241_p9), %v2080_v0  ;;  %v278_v4 = vld [vmem:[%s3442_s1] sm:$0x7] (!%p241_p9)  ;;  %v279_v5 = vld [vmem:[%s3442_s1 + $0x4] sm:$0x7] (!%p241_p9)  ;;  %s3388_s19 = scalar_lea.hbm (!%p241_p9), %s3448_s7, %s1979_s15 }
   0xf   : > { %v314_v3 = vshrl.u32 (!%p241_p9), %v313_v1, 7  ;;  %1999 = vmatpush3.bf16.msra.mxu0 (!%p241_p9), %v2080_v0  ;;  %2036 = vmatpush3.bf16.msra.mxu1 (!%p241_p9), %v2080_v0  ;;  %v280_v6 = vld [vmem:[%s3442_s1 + $0x8] sm:$0x7] (!%p241_p9)  ;;  %s2148_s21 = smov (!%p241_p9), [#allocation2]  }
  0x10   : > { %2000 = vmatprep.subr.bf16.mxu0 (!%p241_p9), %v2081_v2  ;;  %2035 = vmatprep.subr.bf16.mxu1 (!%p241_p9), %v2081_v2  ;;  %s2088_s23 = sshll.u32 (!%p241_p9), %s2148_s21, 4  ;;  %s2089_s23 = int_to_ptr.vmem [resolvable:$false] %s2088_s23 }
  0x11   : > { %v315_v7 = vsub.s32 (!%p241_p9), 0, %v314_v3  ;;  %v415_v8 = vsub.s32 (!%p241_p9), 1, %v314_v3  ;;  %v515_v9 = vsub.s32 (!%p241_p9), 2, %v314_v3  ;;  %s2090_s29 = scalar_lea.vmem (!%p241_p9), %s2089_s23, 8192 }
  0x13   : > { %v2261_v10 = vrot.slane (!%p241_p9), %v278_v4, %v315_v7  ;;  %v2263_v11 = vrot.slane (!%p241_p9), %v278_v4, %v415_v8  ;;  %v2265_v12 = vrot.slane (!%p241_p9), %v278_v4, %v515_v9  ;;  %v2267_v13 = vrot.slane (!%p241_p9), %v279_v5, %v315_v7  ;;  %2001 = vmatpush3.bf16.msra.mxu0 (!%p241_p9), %v2081_v2 }
  0x14   : > { %2037 = vmatpush3.bf16.msra.mxu1 (!%p241_p9), %v2081_v2  ;;  %v2272_v17 = vrot.slane (!%p241_p9), %v279_v5, %v415_v8  ;;  %v2274_v18 = vrot.slane (!%p241_p9), %v279_v5, %v515_v9  ;;  %v2276_v19 = vrot.slane (!%p241_p9), %v280_v6, %v315_v7  ;;  %v2284_v26 = vrot.slane (!%p241_p9), %v280_v6, %v415_v8 }
  0x15   : > { %s273_s17 = scalar_select %p272_p10, %s2212_s28, 3  ;;  %v2298_v33 = vrot.slane %v280_v6, %v515_v9 }
  0x17   : > { %s2038_s22 = smul.u32 432, %s273_s17 }
  0x19   : > { %s2259_s13 = scalar_lea.vmem %s3441_s0, %s2038_s22  ;;  %s269_s22 = sand.u32 1, %s2138_s25  }
  0x1a   : > { %v281_v14 = vld [vmem:[%s2259_s13] sm:$0xff]  ;;  %v282_v15 = vld [vmem:[%s2259_s13 + $0x8] sm:$0xff]  ;;  %v2290_v30 = vld [vmem:[%s2259_s13 + $0x18] sm:$0xff]  ;;  %s3400_s28 = scalar_lea.sflag [#allocation3], %s269_s22 }
  0x1b   : > { %v381_v16 = vld [vmem:[%s2259_s13 + $0x1] sm:$0xff]  ;;  %v317_v20 = vmul.f32 %v2261_v10, %v281_v14  ;;  %v318_v21 = vmul.f32 %v2261_v10, %v282_v15  ;;  %v382_v22 = vld [vmem:[%s2259_s13 + $0x9] sm:$0xff]  ;;  %v2296_v32 = vld [vmem:[%s2259_s13 + $0x19] sm:$0xff]  ;;  %v618_v35 = vmul.f32 %v2290_v30, %v2267_v13 }
  0x1c   : > { %v417_v23 = vmul.f32 %v2263_v11, %v381_v16  ;;  %v481_v24 = vld [vmem:[%s2259_s13 + $0x2] sm:$0xff]  ;;  %v482_v25 = vld [vmem:[%s2259_s13 + $0xa] sm:$0xff]  ;;  %v418_v27 = vmul.f32 %v2263_v11, %v382_v22  ;;  %v718_v38 = vmul.f32 %v2296_v32, %v2272_v17  ;;  %v2310_v39 = vld [vmem:[%s2259_s13 + $0x1a] sm:$0xff] }
  0x1d   : > { %v517_v28 = vmul.f32 %v2265_v12, %v481_v24  ;;  %v518_v29 = vmul.f32 %v2265_v12, %v482_v25  ;;  %v2293_v31 = vld [vmem:[%s2259_s13 + $0x20] sm:$0xff]  ;;  %v818_v43 = vmul.f32 %v2310_v39, %v2274_v18  ;;  %v2322_v45 = vld [vmem:[%s2259_s13 + $0x30] sm:$0xff]  ;;  %v2325_v46 = vld [vmem:[%s2259_s13 + $0x38] sm:$0xff] }
  0x1e   : > { %v449_v34 = vadd.f32 %v417_v23, %v317_v20  ;;  %v619_v36 = vmul.f32 %v2293_v31, %v2267_v13  ;;  %v2305_v37 = vld [vmem:[%s2259_s13 + $0x21] sm:$0xff]  ;;  %v450_v41 = vadd.f32 %v418_v27, %v318_v21  ;;  %v2328_v47 = vld [vmem:[%s2259_s13 + $0x31] sm:$0xff]  ;;  %v919_v49 = vmul.f32 %v2322_v45, %v2276_v19  ;;  %v2335_v51 = vld [vmem:[%s2259_s13 + $0x39] sm:$0xff] }
  0x1f   : > { %v2313_v40 = vld [vmem:[%s2259_s13 + $0x22] sm:$0xff]  ;;  %v719_v42 = vmul.f32 %v2305_v37, %v2272_v17  ;;  %v920_v50 = vmul.f32 %v2325_v46, %v2276_v19  ;;  %v1019_v52 = vmul.f32 %v2328_v47, %v2284_v26  ;;  %v2340_v53 = vld [vmem:[%s2259_s13 + $0x32] sm:$0xff]  ;;  %v2343_v54 = vld [vmem:[%s2259_s13 + $0x3a] sm:$0xff]  ;;  %v1020_v56 = vmul.f32 %v2335_v51, %v2284_v26 }
  0x20   : > { %v819_v44 = vmul.f32 %v2313_v40, %v2274_v18  ;;  %v549_v48 = vadd.f32 %v517_v28, %v449_v34  ;;  %v550_v55 = vadd.f32 %v518_v29, %v450_v41  ;;  %v1119_v57 = vmul.f32 %v2340_v53, %v2298_v33  ;;  %v297_v59 = vld [vmem:[%s2259_s13 + $0xc0] sm:$0xff]  ;;  %v298_v60 = vld [vmem:[%s2259_s13 + $0xc8] sm:$0xff]  ;;  %v2366_v9 = vld [vmem:[%s2259_s13 + $0xd8] sm:$0xff] }
  0x21   : > { %v2351_v58 = vmul.f32 %v2343_v54, %v2298_v33  ;;  %v397_v61 = vld [vmem:[%s2259_s13 + $0xc1] sm:$0xff]  ;;  %v333_v63 = vmul.f32 %v2261_v10, %v297_v59  ;;  %v334_v0 = vmul.f32 %v2261_v10, %v298_v60  ;;  %v398_v1 = vld [vmem:[%s2259_s13 + $0xc9] sm:$0xff]  ;;  %v634_v20 = vmul.f32 %v2366_v9, %v2267_v13  ;;  %v2376_v22 = vld [vmem:[%s2259_s13 + $0xd9] sm:$0xff] }
  0x22   : > { %v650_v62 = vadd.f32 %v618_v35, %v549_v48  ;;  %v433_v2 = vmul.f32 %v2263_v11, %v397_v61  ;;  %v497_v3 = vld [vmem:[%s2259_s13 + $0xc2] sm:$0xff]  ;;  %v498_v4 = vld [vmem:[%s2259_s13 + $0xca] sm:$0xff]  ;;  %v651_v5 = vadd.f32 %v619_v36, %v550_v55  ;;  %v434_v6 = vmul.f32 %v2263_v11, %v398_v1  ;;  %v2386_v29 = vld [vmem:[%s2259_s13 + $0xda] sm:$0xff] }
  0x23   : > { %v533_v7 = vmul.f32 %v2265_v12, %v497_v3  ;;  %v534_v8 = vmul.f32 %v2265_v12, %v498_v4  ;;  %v2369_v14 = vld [vmem:[%s2259_s13 + $0xe0] sm:$0xff]  ;;  %v734_v27 = vmul.f32 %v2376_v22, %v2272_v17  ;;  %v2399_v48 = vld [vmem:[%s2259_s13 + $0xf8] sm:$0xff] }
  0x24   : > { %v750_v15 = vadd.f32 %v718_v38, %v650_v62  ;;  %v465_v16 = vadd.f32 %v433_v2, %v333_v63  ;;  %v635_v21 = vmul.f32 %v2369_v14, %v2267_v13  ;;  %v2379_v23 = vld [vmem:[%s2259_s13 + $0xe1] sm:$0xff]  ;;  %v751_v24 = vadd.f32 %v719_v42, %v651_v5  ;;  %v2396_v42 = vld [vmem:[%s2259_s13 + $0xf0] sm:$0xff]  ;;  %v2409_v62 = vld [vmem:[%s2259_s13 + $0xf9] sm:$0xff] }
  0x25   : > { %v466_v25 = vadd.f32 %v434_v6, %v334_v0  ;;  %v735_v28 = vmul.f32 %v2379_v23, %v2272_v17  ;;  %v2389_v34 = vld [vmem:[%s2259_s13 + $0xe2] sm:$0xff]  ;;  %v834_v38 = vmul.f32 %v2386_v29, %v2274_v18  ;;  %v935_v60 = vmul.f32 %v2396_v42, %v2276_v19  ;;  %v2406_v61 = vld [vmem:[%s2259_s13 + $0xf1] sm:$0xff]  ;;  %v2419_v3 = vld [vmem:[%s2259_s13 + $0xfa] sm:$0xff] }
  0x26   : > { %v850_v35 = vadd.f32 %v818_v43, %v750_v15  ;;  %v565_v36 = vadd.f32 %v533_v7, %v465_v16  ;;  %v835_v41 = vmul.f32 %v2389_v34, %v2274_v18  ;;  %v851_v55 = vadd.f32 %v819_v44, %v751_v24  ;;  %v2416_v44 = vld [vmem:[%s2259_s13 + $0xf2] sm:$0xff] }
  0x27   : > { %v566_v59 = vadd.f32 %v534_v8, %v466_v25  ;;  %v936_v43 = vmul.f32 %v2399_v48, %v2276_v19  ;;  %v1035_v1 = vmul.f32 %v2406_v61, %v2284_v26  ;;  %v1036_v2 = vmul.f32 %v2409_v62, %v2284_v26 }
  0x28   : > { %v951_v63 = vadd.f32 %v919_v49, %v850_v35  ;;  %v666_v0 = vadd.f32 %v634_v20, %v565_v36  ;;  %v952_v4 = vadd.f32 %v920_v50, %v851_v55  ;;  %v1135_v6 = vmul.f32 %v2416_v44, %v2298_v33  ;;  %v2432_v50 = vld [vmem:[%s3443_s2] ss:$0 sm:$0xff] }
  0x29   : > { %v667_v5 = vadd.f32 %v635_v21, %v566_v59  ;;  %v1136_v7 = vmul.f32 %v2419_v3, %v2298_v33  ;;  %v319_v15 = vmul.f32 %v2290_v30, %v2261_v10  ;;  %v320_v16 = vmul.f32 %v2293_v31, %v2261_v10 }
  0x2a   : > { %v1051_v49 = vadd.f32 %v1019_v52, %v951_v63  ;;  %v766_v8 = vadd.f32 %v734_v27, %v666_v0  ;;  %v1052_v20 = vadd.f32 %v1020_v56, %v952_v4  ;;  %v419_v24 = vmul.f32 %v2296_v32, %v2263_v11 }
  0x2b   : > { %v767_v21 = vadd.f32 %v735_v28, %v667_v5  ;;  %v420_v52 = vmul.f32 %v2305_v37, %v2263_v11  ;;  %v519_v30 = vmul.f32 %v2310_v39, %v2265_v12  ;;  %v520_v31 = vmul.f32 %v2313_v40, %v2265_v12  ;;  %v2446_v28 = vld [vmem:[%s3444_s3] ss:$0 sm:$0xff] }
  0x2c   : > { %v1151_v25 = vadd.f32 %v1119_v57, %v1051_v49  ;;  %v866_v27 = vadd.f32 %v834_v38, %v766_v8  ;;  %v1152_v56 = vadd.f32 %v2351_v58, %v1052_v20  ;;  %v451_v35 = vadd.f32 %v419_v24, %v319_v15 }
  0x2d   : > { %v867_v32 = vadd.f32 %v835_v41, %v767_v21  ;;  %v452_v36 = vadd.f32 %v420_v52, %v320_v16  ;;  %v620_v38 = vmul.f32 %v2322_v45, %v2267_v13  ;;  %v621_v39 = vmul.f32 %v2325_v46, %v2267_v13 }
  0x2e   : > { %v1190_v37 = vmul.f32 %v2432_v50, %v1151_v25  ;;  %v967_v57 = vadd.f32 %v935_v60, %v866_v27  ;;  %v1191_v40 = vmul.f32 %v2432_v50, %v1152_v56  ;;  %v551_v55 = vadd.f32 %v519_v30, %v451_v35  ;;  %v2465_v25 = vld [vmem:[%s2259_s13 + $0x48] sm:$0xff] }
  0x2f   : > { %v968_v58 = vadd.f32 %v936_v43, %v867_v32  ;;  %v552_v59 = vadd.f32 %v520_v31, %v452_v36  ;;  %v720_v0 = vmul.f32 %v2328_v47, %v2272_v17  ;;  %v721_v60 = vmul.f32 %v2335_v51, %v2272_v17  ;;  %v2471_v27 = vld [vmem:[%s2259_s13 + $0x49] sm:$0xff] }
  0x30   : > { %v1229_v63 = vadd.f32 %v2446_v28, %v1190_v37  ;;  %v1067_v41 = vadd.f32 %v1035_v1, %v967_v57  ;;  %v1230_v4 = vadd.f32 %v2446_v28, %v1191_v40  ;;  %v652_v49 = vadd.f32 %v620_v38, %v551_v55  ;;  %v2482_v37 = vld [vmem:[%s2259_s13 + $0x51] sm:$0xff] }
  0x31   : > { %v1068_v5 = vadd.f32 %v1036_v2, %v968_v58  ;;  %v653_v8 = vadd.f32 %v621_v39, %v552_v59  ;;  %v820_v16 = vmul.f32 %v2340_v53, %v2274_v18  ;;  %v821_v1 = vmul.f32 %v2343_v54, %v2274_v18  ;;  %v2468_v2 = vld [vmem:[%s2259_s13 + $0x50] sm:$0xff] }
  0x32   : > { %v1261_v43 = vmax.f32 %v1229_v63, 0.0  ;;  %v1167_v15 = vadd.f32 %v1135_v6, %v1067_v41  ;;  %v1262_v20 = vmax.f32 %v1230_v4, 0.0  ;;  %v752_v24 = vadd.f32 %v720_v0, %v652_v49  ;;  %v2485_v57 = vld [vmem:[%s2259_s13 + $0x4a] sm:$0xff]  ;;  %v2488_v38 = vld [vmem:[%s2259_s13 + $0x52] sm:$0xff] }
  0x33   : > { %v1168_v21 = vadd.f32 %v1136_v7, %v1068_v5  ;;  %v753_v52 = vadd.f32 %v721_v60, %v653_v8  ;;  %v921_v30 = vmul.f32 %v2465_v25, %v2276_v19  ;;  %v922_v31 = vmul.f32 %v2468_v2, %v2276_v19 }
  0x34   : > { %v1206_v6 = vmul.f32 %v2432_v50, %v1167_v15  ;;  %v1021_v7 = vmul.f32 %v2471_v27, %v2284_v26  ;;  %v1293_v56 = vpack.c.bf16 %v1262_v20, %v1261_v43  ;;  %v852_v35 = vadd.f32 %v820_v16, %v752_v24 }
  0x35   : > { %v1207_v32 = vmul.f32 %v2432_v50, %v1168_v21  ;;  %v853_v36 = vadd.f32 %v821_v1, %v753_v52  ;;  %v1022_v40 = vmul.f32 %v2482_v37, %v2284_v26  ;;  %v1121_v58 = vmul.f32 %v2485_v57, %v2298_v33 }
  0x36   : > { %v1245_v39 = vadd.f32 %v2446_v28, %v1206_v6  ;;  %v1122_v55 = vmul.f32 %v2488_v38, %v2298_v33  ;;  %2002 = vmatprep.mubr.msk.bf16.mxu0 %vm1325_vm0, %v1293_v56  ;;  %v953_v63 = vadd.f32 %v921_v30, %v852_v35  ;;  %v335_v0 = vmul.f32 %v2366_v9, %v2261_v10  ;;  %v2530_v35 = vld [vmem:[%s2259_s13 + $0x110] sm:$0xff] }
  0x37   : > { %v1246_v59 = vadd.f32 %v2446_v28, %v1207_v32  ;;  %v954_v41 = vadd.f32 %v922_v31, %v853_v36  ;;  %v336_v4 = vmul.f32 %v2369_v14, %v2261_v10  ;;  %v435_v5 = vmul.f32 %v2376_v22, %v2263_v11  ;;  %v2527_v32 = vld [vmem:[%s2259_s13 + $0x108] sm:$0xff] }
  0x38   : > { %v1277_v60 = vmax.f32 %v1245_v39, 0.0  ;;  %v436_v49 = vmul.f32 %v2379_v23, %v2263_v11  ;;  %v1053_v43 = vadd.f32 %v1021_v7, %v953_v63  ;;  %v535_v16 = vmul.f32 %v2386_v29, %v2265_v12 }
  0x39   : > { %v1278_v8 = vmax.f32 %v1246_v59, 0.0  ;;  %v1054_v15 = vadd.f32 %v1022_v40, %v954_v41  ;;  %v467_v1 = vadd.f32 %v435_v5, %v335_v0  ;;  %v536_v9 = vmul.f32 %v2389_v34, %v2265_v12  ;;  %v2540_v59 = vld [vmem:[%s2259_s13 + $0x111] sm:$0xff] }
  0x3a   : > { %v468_v20 = vadd.f32 %v436_v49, %v336_v4  ;;  %v636_v14 = vmul.f32 %v2396_v42, %v2267_v13  ;;  %v1153_v21 = vadd.f32 %v1121_v58, %v1053_v43  ;;  %v637_v23 = vmul.f32 %v2399_v48, %v2267_v13  ;;  %v2549_v4 = vld [vmem:[%s2259_s13 + $0x10a] sm:$0xff]  ;;  %v2552_v5 = vld [vmem:[%s2259_s13 + $0x112] sm:$0xff] }
  0x3b   : > { %v1301_v22 = vpack.c.bf16 %v1278_v8, %v1277_v60  ;;  %v1154_v24 = vadd.f32 %v1122_v55, %v1054_v15  ;;  %v567_v52 = vadd.f32 %v535_v16, %v467_v1  ;;  %v736_v6 = vmul.f32 %v2406_v61, %v2272_v17  ;;  %v2537_v55 = vld [vmem:[%s2259_s13 + $0x109] sm:$0xff] }
  0x3c   : > { %v568_v29 = vadd.f32 %v536_v9, %v468_v20  ;;  %v737_v34 = vmul.f32 %v2409_v62, %v2272_v17  ;;  %v1192_v30 = vmul.f32 %v2432_v50, %v1153_v21  ;;  %v836_v7 = vmul.f32 %v2416_v44, %v2274_v18 }
  0x3d   : > { %2018 = vmatprep.mubr.msk.bf16.mxu1 %vm1325_vm0, %v1301_v22  ;;  %v1193_v31 = vmul.f32 %v2432_v50, %v1154_v24  ;;  %v837_v56 = vmul.f32 %v2419_v3, %v2274_v18  ;;  %v668_v36 = vadd.f32 %v636_v14, %v567_v52  ;;  %v937_v40 = vmul.f32 %v2527_v32, %v2276_v19 }
  0x3e   : > { %v669_v39 = vadd.f32 %v637_v23, %v568_v29  ;;  %v938_v58 = vmul.f32 %v2530_v35, %v2276_v19  ;;  %v1231_v63 = vadd.f32 %v2446_v28, %v1192_v30  ;;  %v1037_v0 = vmul.f32 %v2537_v55, %v2284_v26 }
  0x3f   : > { %v1232_v41 = vadd.f32 %v2446_v28, %v1193_v31  ;;  %v1038_v60 = vmul.f32 %v2540_v59, %v2284_v26  ;;  %v768_v49 = vadd.f32 %v736_v6, %v668_v36  ;;  %v1137_v43 = vmul.f32 %v2549_v4, %v2298_v33 }
  0x40   : > { %v769_v8 = vadd.f32 %v737_v34, %v669_v39  ;;  %v1138_v15 = vmul.f32 %v2552_v5, %v2298_v33  ;;  %v1263_v16 = vmax.f32 %v1231_v63, 0.0  ;;  %v321_v20 = vmul.f32 %v2322_v45, %v2261_v10  ;;  %v2582_v39 = vld [vmem:[%s2259_s13 + $0x60] sm:$0xff] }
  0x41   : > { %v1264_v1 = vmax.f32 %v1232_v41, 0.0  ;;  %v322_v9 = vmul.f32 %v2325_v46, %v2261_v10  ;;  %v868_v14 = vadd.f32 %v836_v7, %v768_v49  ;;  %v421_v21 = vmul.f32 %v2328_v47, %v2263_v11 }
  0x42   : > { %v869_v22 = vadd.f32 %v837_v56, %v769_v8  ;;  %v422_v24 = vmul.f32 %v2335_v51, %v2263_v11  ;;  %v521_v52 = vmul.f32 %v2340_v53, %v2265_v12  ;;  %v522_v29 = vmul.f32 %v2343_v54, %v2265_v12 }
  0x43   : > { %v1294_v23 = vpack.c.bf16 %v1264_v1, %v1263_v16  ;;  %v622_v45 = vmul.f32 %v2465_v25, %v2267_v13  ;;  %v969_v46 = vadd.f32 %v937_v40, %v868_v14  ;;  %v453_v34 = vadd.f32 %v421_v21, %v321_v20  ;;  %v2585_v40 = vld [vmem:[%s2259_s13 + $0x68] sm:$0xff] }
  0x44   : > { %v970_v6 = vadd.f32 %v938_v58, %v869_v22  ;;  %v454_v47 = vadd.f32 %v422_v24, %v322_v9  ;;  %v623_v51 = vmul.f32 %v2468_v2, %v2267_v13  ;;  %v722_v53 = vmul.f32 %v2471_v27, %v2272_v17  ;;  %v2588_v58 = vld [vmem:[%s2259_s13 + $0x61] sm:$0xff]  ;;  %v2599_v20 = vld [vmem:[%s2259_s13 + $0x69] sm:$0xff] }
  0x45   : > { %2003 = vmatmul.mubr.msk.bf16.vlgmr.msra.gmra.mrb[0].mxu0 %vm1325_vm0, %v1294_v23  ;;  %v723_v54 = vmul.f32 %v2482_v37, %v2272_v17  ;;  %v822_v30 = vmul.f32 %v2485_v57, %v2274_v18  ;;  %v1069_v31 = vadd.f32 %v1037_v0, %v969_v46  ;;  %v553_v56 = vadd.f32 %v521_v52, %v453_v34  ;;  %v2602_v9 = vld [vmem:[%s2259_s13 + $0x62] sm:$0xff]  ;;  %v2605_v14 = vld [vmem:[%s2259_s13 + $0x6a] sm:$0xff] }
  0x46   : > { %v1070_v7 = vadd.f32 %v1038_v60, %v970_v6  ;;  %v554_v36 = vadd.f32 %v522_v29, %v454_v47  ;;  %v823_v63 = vmul.f32 %v2488_v38, %v2274_v18  ;;  %v923_v41 = vmul.f32 %v2582_v39, %v2276_v19 }
  0x47   : > { %v924_v0 = vmul.f32 %v2585_v40, %v2276_v19  ;;  %v1023_v60 = vmul.f32 %v2588_v58, %v2284_v26  ;;  %v1169_v49 = vadd.f32 %v1137_v43, %v1069_v31  ;;  %v654_v16 = vadd.f32 %v622_v45, %v553_v56 }
  0x48   : > { %v1170_v8 = vadd.f32 %v1138_v15, %v1070_v7  ;;  %v655_v1 = vadd.f32 %v623_v51, %v554_v36  ;;  %v1024_v22 = vmul.f32 %v2599_v20, %v2284_v26  ;;  %v1123_v21 = vmul.f32 %v2602_v9, %v2298_v33 }
  0x49   : > { %v1124_v24 = vmul.f32 %v2605_v14, %v2298_v33  ;;  %v337_v43 = vmul.f32 %v2396_v42, %v2261_v10  ;;  %v1208_v15 = vmul.f32 %v2432_v50, %v1169_v49  ;;  %v754_v52 = vadd.f32 %v722_v53, %v654_v16 }
  0x4a   : > { %v1209_v23 = vmul.f32 %v2432_v50, %v1170_v8  ;;  %v755_v29 = vadd.f32 %v723_v54, %v655_v1  ;;  %v338_v45 = vmul.f32 %v2399_v48, %v2261_v10  ;;  %v437_v46 = vmul.f32 %v2406_v61, %v2263_v11 }
  0x4b   : > { %v438_v6 = vmul.f32 %v2409_v62, %v2263_v11  ;;  %v537_v34 = vmul.f32 %v2416_v44, %v2265_v12  ;;  %v1247_v42 = vadd.f32 %v2446_v28, %v1208_v15  ;;  %v854_v51 = vadd.f32 %v822_v30, %v754_v52  ;;  %v2645_v52 = vld [vmem:[%s2259_s13 + $0x128] sm:$0xff] }
  0x4c   : > { %v1248_v47 = vadd.f32 %v2446_v28, %v1209_v23  ;;  %v855_v31 = vadd.f32 %v823_v63, %v755_v29  ;;  %v469_v53 = vadd.f32 %v437_v46, %v337_v43  ;;  %v538_v48 = vmul.f32 %v2419_v3, %v2265_v12  ;;  %v2642_v23 = vld [vmem:[%s2259_s13 + $0x120] sm:$0xff] }
  0x4d   : > { %v470_v54 = vadd.f32 %v438_v6, %v338_v45  ;;  %v638_v61 = vmul.f32 %v2527_v32, %v2267_v13  ;;  %v1279_v7 = vmax.f32 %v1247_v42, 0.0  ;;  %v955_v56 = vadd.f32 %v923_v41, %v854_v51  ;;  %v2653_v46 = vld [vmem:[%s2259_s13 + $0x121] sm:$0xff]  ;;  %v2656_v6 = vld [vmem:[%s2259_s13 + $0x129] sm:$0xff] }
  0x4e   : > { %v1280_v62 = vmax.f32 %v1248_v47, 0.0  ;;  %v956_v44 = vadd.f32 %v924_v0, %v855_v31  ;;  %v569_v36 = vadd.f32 %v537_v34, %v469_v53  ;;  %v639_v30 = vmul.f32 %v2530_v35, %v2267_v13 }
  0x4f   : > { %v570_v49 = vadd.f32 %v538_v48, %v470_v54  ;;  %v738_v63 = vmul.f32 %v2537_v55, %v2272_v17  ;;  %v1055_v3 = vadd.f32 %v1023_v60, %v955_v56  ;;  %v739_v1 = vmul.f32 %v2540_v59, %v2272_v17 }
  0x50   : > { %v1302_v8 = vpack.c.bf16 %v1280_v62, %v1279_v7  ;;  %v1056_v16 = vadd.f32 %v1024_v22, %v956_v44  ;;  %v670_v43 = vadd.f32 %v638_v61, %v569_v36  ;;  %v838_v41 = vmul.f32 %v2549_v4, %v2274_v18 }
  0x51   : > { %v671_v15 = vadd.f32 %v639_v30, %v570_v49  ;;  %v839_v0 = vmul.f32 %v2552_v5, %v2274_v18  ;;  %v1155_v60 = vadd.f32 %v1123_v21, %v1055_v3  ;;  %v939_v29 = vmul.f32 %v2642_v23, %v2276_v19  ;;  %v2663_v21 = vld [vmem:[%s2259_s13 + $0x122] sm:$0xff] }
  0x52   : > { %2019 = vmatmul.mubr.msk.bf16.vlgmr.msra.gmra.mrb[0].mxu1 %vm1325_vm0, %v1302_v8  ;;  %v1156_v22 = vadd.f32 %v1124_v24, %v1056_v16  ;;  %v940_v45 = vmul.f32 %v2645_v52, %v2276_v19  ;;  %v770_v34 = vadd.f32 %v738_v63, %v670_v43  ;;  %v1039_v47 = vmul.f32 %v2653_v46, %v2284_v26  ;;  %v2666_v24 = vld [vmem:[%s2259_s13 + $0x12a] sm:$0xff] }
  0x53   : > { %v771_v42 = vadd.f32 %v739_v1, %v671_v15  ;;  %v1040_v51 = vmul.f32 %v2656_v6, %v2284_v26  ;;  %v1194_v31 = vmul.f32 %v2432_v50, %v1155_v60  ;;  %v1139_v54 = vmul.f32 %v2663_v21, %v2298_v33 }
  0x54   : > { %v1195_v53 = vmul.f32 %v2432_v50, %v1156_v22  ;;  %v1140_v48 = vmul.f32 %v2666_v24, %v2298_v33  ;;  %v870_v61 = vadd.f32 %v838_v41, %v770_v34  ;;  %v323_v62 = vmul.f32 %v2465_v25, %v2261_v10 }
  0x55   : > { %v871_v7 = vadd.f32 %v839_v0, %v771_v42  ;;  %v324_v56 = vmul.f32 %v2468_v2, %v2261_v10  ;;  %v1233_v44 = vadd.f32 %v2446_v28, %v1194_v31  ;;  %v423_v49 = vmul.f32 %v2471_v27, %v2263_v11  ;;  %v2699_v42 = vld [vmem:[%s2259_s13 + $0x78] sm:$0xff] }
  0x56   : > { %v1234_v36 = vadd.f32 %v2446_v28, %v1195_v53  ;;  %v424_v30 = vmul.f32 %v2482_v37, %v2263_v11  ;;  %v971_v63 = vadd.f32 %v939_v29, %v870_v61  ;;  %v523_v3 = vmul.f32 %v2485_v57, %v2265_v12  ;;  %v2705_v53 = vld [vmem:[%s2259_s13 + $0x80] sm:$0xff] }
  0x57   : > { %v972_v8 = vadd.f32 %v940_v45, %v871_v7  ;;  %v524_v25 = vmul.f32 %v2488_v38, %v2265_v12  ;;  %v1265_v16 = vmax.f32 %v1233_v44, 0.0  ;;  %v455_v1 = vadd.f32 %v423_v49, %v323_v62 }
  0x58   : > { %v1266_v2 = vmax.f32 %v1234_v36, 0.0  ;;  %v456_v43 = vadd.f32 %v424_v30, %v324_v56  ;;  %v1071_v15 = vadd.f32 %v1039_v47, %v971_v63  ;;  %v624_v27 = vmul.f32 %v2582_v39, %v2267_v13  ;;  %v2717_v56 = vld [vmem:[%s2259_s13 + $0x81] sm:$0xff] }
  0x59   : > { %v1072_v41 = vadd.f32 %v1040_v51, %v972_v8  ;;  %v625_v37 = vmul.f32 %v2585_v40, %v2267_v13  ;;  %v555_v57 = vadd.f32 %v523_v3, %v455_v1  ;;  %v724_v38 = vmul.f32 %v2588_v58, %v2272_v17  ;;  %v2722_v36 = vld [vmem:[%s2259_s13 + $0x7a] sm:$0xff]  ;;  %v2727_v8 = vld [vmem:[%s2259_s13 + $0x82] sm:$0xff] }
  0x5a   : > { %v1295_v0 = vpack.c.bf16 %v1266_v2, %v1265_v16  ;;  %v556_v60 = vadd.f32 %v524_v25, %v456_v43  ;;  %v1171_v22 = vadd.f32 %v1139_v54, %v1071_v15  ;;  %v725_v45 = vmul.f32 %v2599_v20, %v2272_v17 }
  0x5b   : > { %v1172_v29 = vadd.f32 %v1140_v48, %v1072_v41  ;;  %v824_v34 = vmul.f32 %v2602_v9, %v2274_v18  ;;  %v656_v47 = vadd.f32 %v624_v27, %v555_v57  ;;  %v825_v31 = vmul.f32 %v2605_v14, %v2274_v18  ;;  %v2710_v48 = vld [vmem:[%s2259_s13 + $0x79] sm:$0xff] }
  0x5c   : > { %2006 = vmatprep.mubr.msk.bf16.mxu0 %vm1325_vm0, %v1295_v0  ;;  %v657_v51 = vadd.f32 %v625_v37, %v556_v60  ;;  %v925_v54 = vmul.f32 %v2699_v42, %v2276_v19  ;;  %v1210_v61 = vmul.f32 %v2432_v50, %v1171_v22  ;;  %v926_v62 = vmul.f32 %v2705_v53, %v2276_v19 }
  0x5d   : > { %v1211_v7 = vmul.f32 %v2432_v50, %v1172_v29  ;;  %v1025_v44 = vmul.f32 %v2710_v48, %v2284_v26  ;;  %v756_v49 = vadd.f32 %v724_v38, %v656_v47  ;;  %v1026_v63 = vmul.f32 %v2717_v56, %v2284_v26 }
  0x5e   : > { %v757_v30 = vadd.f32 %v725_v45, %v657_v51  ;;  %v1125_v3 = vmul.f32 %v2722_v36, %v2298_v33  ;;  %v1249_v25 = vadd.f32 %v2446_v28, %v1210_v61  ;;  %v1126_v2 = vmul.f32 %v2727_v8, %v2298_v33 }
  0x5f   : > { %v1250_v16 = vadd.f32 %v2446_v28, %v1211_v7  ;;  %v339_v1 = vmul.f32 %v2527_v32, %v2261_v10  ;;  %v856_v43 = vadd.f32 %v824_v34, %v756_v49  ;;  %v340_v41 = vmul.f32 %v2530_v35, %v2261_v10  ;;  %v2761_v7 = vld [vmem:[%s2259_s13 + $0x138] sm:$0xff] }
  0x60   : > { %v857_v15 = vadd.f32 %v825_v31, %v757_v30  ;;  %v439_v27 = vmul.f32 %v2537_v55, %v2263_v11  ;;  %v1281_v37 = vmax.f32 %v1249_v25, 0.0  ;;  %v440_v57 = vmul.f32 %v2540_v59, %v2263_v11  ;;  %v2764_v30 = vld [vmem:[%s2259_s13 + $0x140] sm:$0xff] }
  0x61   : > { %v1282_v0 = vmax.f32 %v1250_v16, 0.0  ;;  %v539_v60 = vmul.f32 %v2549_v4, %v2265_v12  ;;  %v957_v38 = vadd.f32 %v925_v54, %v856_v43  ;;  %v540_v29 = vmul.f32 %v2552_v5, %v2265_v12  ;;  %v2769_v25 = vld [vmem:[%s2259_s13 + $0x139] sm:$0xff]  ;;  %v2772_v16 = vld [vmem:[%s2259_s13 + $0x141] sm:$0xff] }
  0x62   : > { %v958_v22 = vadd.f32 %v926_v62, %v857_v15  ;;  %v471_v32 = vadd.f32 %v439_v27, %v339_v1  ;;  %v472_v35 = vadd.f32 %v440_v57, %v340_v41  ;;  %v640_v55 = vmul.f32 %v2642_v23, %v2267_v13 }
  0x63   : > { %v1303_v45 = vpack.c.bf16 %v1282_v0, %v1281_v37  ;;  %v641_v34 = vmul.f32 %v2645_v52, %v2267_v13  ;;  %v1057_v59 = vadd.f32 %v1025_v44, %v957_v38  ;;  %v740_v51 = vmul.f32 %v2653_v46, %v2272_v17  ;;  %v2786_v0 = vld [vmem:[%s2259_s13 + $0x142] sm:$0xff] }
  0x64   : > { %v1058_v4 = vadd.f32 %v1026_v63, %v958_v22  ;;  %v571_v47 = vadd.f32 %v539_v60, %v471_v32  ;;  %v572_v5 = vadd.f32 %v540_v29, %v472_v35  ;;  %v741_v31 = vmul.f32 %v2656_v6, %v2272_v17 }
  0x65   : > { %2022 = vmatprep.mubr.msk.bf16.mxu1 %vm1325_vm0, %v1303_v45  ;;  %v840_v54 = vmul.f32 %v2663_v21, %v2274_v18  ;;  %v841_v61 = vmul.f32 %v2666_v24, %v2274_v18  ;;  %v1157_v62 = vadd.f32 %v1125_v3, %v1057_v59  ;;  %v941_v63 = vmul.f32 %v2761_v7, %v2276_v19 }
  0x66   : > { %v1158_v44 = vadd.f32 %v1126_v2, %v1058_v4  ;;  %v672_v49 = vadd.f32 %v640_v55, %v571_v47  ;;  %v673_v1 = vadd.f32 %v641_v34, %v572_v5  ;;  %v942_v43 = vmul.f32 %v2764_v30, %v2276_v19  ;;  %v2781_v2 = vld [vmem:[%s2259_s13 + $0x13a] sm:$0xff] }
  0x67   : > { %v1041_v15 = vmul.f32 %v2769_v25, %v2284_v26  ;;  %v1042_v3 = vmul.f32 %v2772_v16, %v2284_v26  ;;  %v1196_v41 = vmul.f32 %v2432_v50, %v1157_v62  ;;  %v1141_v57 = vmul.f32 %v2781_v2, %v2298_v33 }
  0x68   : > { %v1197_v27 = vmul.f32 %v2432_v50, %v1158_v44  ;;  %v772_v37 = vadd.f32 %v740_v51, %v672_v49  ;;  %v773_v60 = vadd.f32 %v741_v31, %v673_v1  ;;  %v1142_v38 = vmul.f32 %v2786_v0, %v2298_v33 }
  0x69   : > { %v325_v22 = vmul.f32 %v2582_v39, %v2261_v10  ;;  %v326_v32 = vmul.f32 %v2585_v40, %v2261_v10  ;;  %v1235_v29 = vadd.f32 %v2446_v28, %v1196_v41  ;;  %v425_v55 = vmul.f32 %v2588_v58, %v2263_v11 }
  0x6a   : > { %v1236_v45 = vadd.f32 %v2446_v28, %v1197_v27  ;;  %v872_v35 = vadd.f32 %v840_v54, %v772_v37  ;;  %v873_v34 = vadd.f32 %v841_v61, %v773_v60  ;;  %v426_v59 = vmul.f32 %v2599_v20, %v2263_v11  ;;  %v2823_v37 = vld [vmem:[%s2259_s13 + $0x98] sm:$0xff] }
  0x6b   : > { %v525_v4 = vmul.f32 %v2602_v9, %v2265_v12  ;;  %v526_v39 = vmul.f32 %v2605_v14, %v2265_v12  ;;  %v1267_v47 = vmax.f32 %v1235_v29, 0.0  ;;  %v457_v5 = vadd.f32 %v425_v55, %v325_v22  ;;  %v2828_v60 = vld [vmem:[%s2259_s13 + $0x91] sm:$0xff] }
  0x6c   : > { %v1268_v40 = vmax.f32 %v1236_v45, 0.0  ;;  %v973_v51 = vadd.f32 %v941_v63, %v872_v35  ;;  %v974_v31 = vadd.f32 %v942_v43, %v873_v34  ;;  %v458_v54 = vadd.f32 %v426_v59, %v326_v32  ;;  %v2817_v43 = vld [vmem:[%s2259_s13 + $0x90] sm:$0xff]  ;;  %v2833_v45 = vld [vmem:[%s2259_s13 + $0x99] sm:$0xff] }
  0x6d   : > { %v626_v58 = vmul.f32 %v2699_v42, %v2267_v13  ;;  %v627_v20 = vmul.f32 %v2705_v53, %v2267_v13  ;;  %v557_v62 = vadd.f32 %v525_v4, %v457_v5  ;;  %v726_v14 = vmul.f32 %v2710_v48, %v2272_v17  ;;  %v2838_v35 = vld [vmem:[%s2259_s13 + $0x92] sm:$0xff]  ;;  %v2844_v4 = vld [vmem:[%s2259_s13 + $0x9a] sm:$0xff] }
  0x6e   : > { %v1296_v61 = vpack.c.bf16 %v1268_v40, %v1267_v47  ;;  %v1073_v9 = vadd.f32 %v1041_v15, %v973_v51  ;;  %v1074_v44 = vadd.f32 %v1042_v3, %v974_v31  ;;  %v558_v49 = vadd.f32 %v526_v39, %v458_v54 }
  0x6f   : > { %v727_v63 = vmul.f32 %v2717_v56, %v2272_v17  ;;  %v826_v1 = vmul.f32 %v2722_v36, %v2274_v18  ;;  %v658_v41 = vadd.f32 %v626_v58, %v557_v62  ;;  %v827_v27 = vmul.f32 %v2727_v8, %v2274_v18 }
  0x70   : > { %2007 = vmatmul.mubr.msk.bf16.gmra.mrb[4].mxu0 %vm1325_vm0, %v1296_v61  ;;  %v1173_v15 = vadd.f32 %v1141_v57, %v1073_v9  ;;  %v927_v3 = vmul.f32 %v2817_v43, %v2276_v19  ;;  %v1174_v22 = vadd.f32 %v1142_v38, %v1074_v44  ;;  %v659_v32 = vadd.f32 %v627_v20, %v558_v49 }
  0x71   : > { %v928_v29 = vmul.f32 %v2823_v37, %v2276_v19  ;;  %v1027_v57 = vmul.f32 %v2828_v60, %v2284_v26  ;;  %v758_v34 = vadd.f32 %v726_v14, %v658_v41  ;;  %v1028_v59 = vmul.f32 %v2833_v45, %v2284_v26 }
  0x72   : > { %v1212_v55 = vmul.f32 %v2432_v50, %v1173_v15  ;;  %v1127_v38 = vmul.f32 %v2838_v35, %v2298_v33  ;;  %v1213_v39 = vmul.f32 %v2432_v50, %v1174_v22  ;;  %v759_v47 = vadd.f32 %v727_v63, %v659_v32 }
  0x73   : > { %v1128_v40 = vmul.f32 %v2844_v4, %v2298_v33  ;;  %v341_v51 = vmul.f32 %v2642_v23, %v2261_v10  ;;  %v858_v31 = vadd.f32 %v826_v1, %v758_v34  ;;  %v342_v54 = vmul.f32 %v2645_v52, %v2261_v10  ;;  %v2878_v34 = vld [vmem:[%s2259_s13 + $0x150] sm:$0xff] }
  0x74   : > { %v1251_v5 = vadd.f32 %v2446_v28, %v1212_v55  ;;  %v441_v58 = vmul.f32 %v2653_v46, %v2263_v11  ;;  %v1252_v20 = vadd.f32 %v2446_v28, %v1213_v39  ;;  %v859_v61 = vadd.f32 %v827_v27, %v759_v47  ;;  %v2881_v39 = vld [vmem:[%s2259_s13 + $0x158] sm:$0xff] }
  0x75   : > { %v442_v9 = vmul.f32 %v2656_v6, %v2263_v11  ;;  %v541_v62 = vmul.f32 %v2663_v21, %v2265_v12  ;;  %v959_v23 = vadd.f32 %v927_v3, %v858_v31  ;;  %v542_v49 = vmul.f32 %v2666_v24, %v2265_v12  ;;  %v2892_v31 = vld [vmem:[%s2259_s13 + $0x159] sm:$0xff] }
  0x76   : > { %v1283_v14 = vmax.f32 %v1251_v5, 0.0  ;;  %v473_v44 = vadd.f32 %v441_v58, %v341_v51  ;;  %v1284_v63 = vmax.f32 %v1252_v20, 0.0  ;;  %v960_v52 = vadd.f32 %v928_v29, %v859_v61  ;;  %v2889_v5 = vld [vmem:[%s2259_s13 + $0x151] sm:$0xff] }
  0x77   : > { %v474_v46 = vadd.f32 %v442_v9, %v342_v54  ;;  %v642_v1 = vmul.f32 %v2761_v7, %v2267_v13  ;;  %v1059_v15 = vadd.f32 %v1027_v57, %v959_v23  ;;  %v643_v6 = vmul.f32 %v2764_v30, %v2267_v13  ;;  %v2900_v61 = vld [vmem:[%s2259_s13 + $0x152] sm:$0xff]  ;;  %v2903_v9 = vld [vmem:[%s2259_s13 + $0x15a] sm:$0xff] }
  0x78   : > { %v573_v41 = vadd.f32 %v541_v62, %v473_v44  ;;  %v742_v21 = vmul.f32 %v2769_v25, %v2272_v17  ;;  %v1304_v27 = vpack.c.bf16 %v1284_v63, %v1283_v14  ;;  %v1060_v24 = vadd.f32 %v1028_v59, %v960_v52 }
  0x79   : > { %v574_v3 = vadd.f32 %v542_v49, %v474_v46  ;;  %v743_v22 = vmul.f32 %v2772_v16, %v2272_v17  ;;  %v1159_v32 = vadd.f32 %v1127_v38, %v1059_v15  ;;  %v842_v57 = vmul.f32 %v2781_v2, %v2274_v18 }
  0x7a   : > { %v674_v29 = vadd.f32 %v642_v1, %v573_v41  ;;  %v843_v55 = vmul.f32 %v2786_v0, %v2274_v18  ;;  %2023 = vmatmul.mubr.msk.bf16.gmra.mrb[4].mxu1 %vm1325_vm0, %v1304_v27  ;;  %v1160_v59 = vadd.f32 %v1128_v40, %v1060_v24  ;;  %v943_v38 = vmul.f32 %v2878_v34, %v2276_v19 }
  0x7b   : > { %v675_v47 = vadd.f32 %v643_v6, %v574_v3  ;;  %v944_v51 = vmul.f32 %v2881_v39, %v2276_v19  ;;  %v1198_v54 = vmul.f32 %v2432_v50, %v1159_v32  ;;  %v1043_v20 = vmul.f32 %v2889_v5, %v2284_v26 }
  0x7c   : > { %v774_v58 = vadd.f32 %v742_v21, %v674_v29  ;;  %v1044_v40 = vmul.f32 %v2892_v31, %v2284_v26  ;;  %v1199_v62 = vmul.f32 %v2432_v50, %v1160_v59  ;;  %v1143_v23 = vmul.f32 %v2900_v61, %v2298_v33 }
  0x7d   : > { %v775_v14 = vadd.f32 %v743_v22, %v675_v47  ;;  %v1144_v44 = vmul.f32 %v2903_v9, %v2298_v33  ;;  %v1237_v49 = vadd.f32 %v2446_v28, %v1198_v54  ;;  %v327_v52 = vmul.f32 %v2699_v42, %v2261_v10 }
  0x7e   : > { %v874_v63 = vadd.f32 %v842_v57, %v774_v58  ;;  %v328_v46 = vmul.f32 %v2705_v53, %v2261_v10  ;;  %v1238_v1 = vadd.f32 %v2446_v28, %v1199_v62  ;;  %v427_v41 = vmul.f32 %v2710_v48, %v2263_v11  ;;  %v2937_v58 = vld [vmem:[%s2259_s13 + $0xa8] sm:$0xff] }
  0x7f   : > { %v875_v15 = vadd.f32 %v843_v55, %v775_v14  ;;  %v428_v6 = vmul.f32 %v2717_v56, %v2263_v11  ;;  %v1269_v21 = vmax.f32 %v1237_v49, 0.0  ;;  %v527_v24 = vmul.f32 %v2722_v36, %v2265_v12  ;;  %v2941_v14 = vld [vmem:[%s2259_s13 + $0xb0] sm:$0xff] }
  0x80   : > { %v975_v27 = vadd.f32 %v943_v38, %v874_v63  ;;  %v528_v42 = vmul.f32 %v2727_v8, %v2265_v12  ;;  %v1270_v3 = vmax.f32 %v1238_v1, 0.0  ;;  %v459_v22 = vadd.f32 %v427_v41, %v327_v52  ;;  %v2946_v49 = vld [vmem:[%s2259_s13 + $0xa9] sm:$0xff]  ;;  %v2949_v63 = vld [vmem:[%s2259_s13 + $0xb1] sm:$0xff] }
  0x81   : > { %v976_v53 = vadd.f32 %v944_v51, %v875_v15  ;;  %v460_v32 = vadd.f32 %v428_v6, %v328_v46  ;;  %v628_v48 = vmul.f32 %v2817_v43, %v2267_v13  ;;  %v629_v56 = vmul.f32 %v2823_v37, %v2267_v13  ;;  %v2959_v15 = vld [vmem:[%s2259_s13 + $0xaa] sm:$0xff] }
  0x82   : > { %v1075_v29 = vadd.f32 %v1043_v20, %v975_v27  ;;  %v728_v57 = vmul.f32 %v2828_v60, %v2272_v17  ;;  %v1297_v36 = vpack.c.bf16 %v1270_v3, %v1269_v21  ;;  %v559_v55 = vadd.f32 %v527_v24, %v459_v22  ;;  %v2963_v27 = vld [vmem:[%s2259_s13 + $0xb2] sm:$0xff] }
  0x83   : > { %v1076_v8 = vadd.f32 %v1044_v40, %v976_v53  ;;  %v560_v59 = vadd.f32 %v528_v42, %v460_v32  ;;  %v729_v38 = vmul.f32 %v2833_v45, %v2272_v17  ;;  %v828_v51 = vmul.f32 %v2838_v35, %v2274_v18 }
  0x84   : > { %v1175_v47 = vadd.f32 %v1143_v23, %v1075_v29  ;;  %v829_v54 = vmul.f32 %v2844_v4, %v2274_v18  ;;  %2010 = vmatprep.mubr.msk.bf16.mxu0 %vm1325_vm0, %v1297_v36  ;;  %v660_v40 = vadd.f32 %v628_v48, %v559_v55  ;;  %v929_v23 = vmul.f32 %v2937_v58, %v2276_v19 }
  0x85   : > { %v1176_v20 = vadd.f32 %v1144_v44, %v1076_v8  ;;  %v661_v62 = vadd.f32 %v629_v56, %v560_v59  ;;  %v930_v46 = vmul.f32 %v2941_v14, %v2276_v19  ;;  %v1029_v1 = vmul.f32 %v2946_v49, %v2284_v26 }
  0x86   : > { %v1214_v52 = vmul.f32 %v2432_v50, %v1175_v47  ;;  %v1030_v44 = vmul.f32 %v2949_v63, %v2284_v26  ;;  %v760_v6 = vadd.f32 %v728_v57, %v660_v40  ;;  %v1129_v24 = vmul.f32 %v2959_v15, %v2298_v33 }
  0x87   : > { %v1215_v41 = vmul.f32 %v2432_v50, %v1176_v20  ;;  %v761_v21 = vadd.f32 %v729_v38, %v661_v62  ;;  %v1130_v3 = vmul.f32 %v2963_v27, %v2298_v33  ;;  %v343_v53 = vmul.f32 %v2761_v7, %v2261_v10 }
  0x88   : > { %v1253_v42 = vadd.f32 %v2446_v28, %v1214_v52  ;;  %v344_v22 = vmul.f32 %v2764_v30, %v2261_v10  ;;  %v860_v29 = vadd.f32 %v828_v51, %v760_v6  ;;  %v443_v56 = vmul.f32 %v2769_v25, %v2263_v11  ;;  %v3000_v6 = vld [vmem:[%s2259_s13 + $0x170] sm:$0xff] }
  0x89   : > { %v1254_v32 = vadd.f32 %v2446_v28, %v1215_v41  ;;  %v861_v48 = vadd.f32 %v829_v54, %v761_v21  ;;  %v444_v36 = vmul.f32 %v2772_v16, %v2263_v11  ;;  %v543_v8 = vmul.f32 %v2781_v2, %v2265_v12 }
  0x8a   : > { %v1285_v57 = vmax.f32 %v1253_v42, 0.0  ;;  %v544_v7 = vmul.f32 %v2786_v0, %v2265_v12  ;;  %v961_v30 = vadd.f32 %v929_v23, %v860_v29  ;;  %v475_v47 = vadd.f32 %v443_v56, %v343_v53  ;;  %v3005_v42 = vld [vmem:[%s2259_s13 + $0x169] sm:$0xff]  ;;  %v3008_v53 = vld [vmem:[%s2259_s13 + $0x171] sm:$0xff] }
  0x8b   : > { %v1286_v55 = vmax.f32 %v1254_v32, 0.0  ;;  %v962_v59 = vadd.f32 %v930_v46, %v861_v48  ;;  %v476_v38 = vadd.f32 %v444_v36, %v344_v22  ;;  %v644_v51 = vmul.f32 %v2878_v34, %v2267_v13  ;;  %v2996_v46 = vld [vmem:[%s2259_s13 + $0x168] sm:$0xff]  ;;  %v3022_v36 = vld [vmem:[%s2259_s13 + $0x172] sm:$0xff] }
  0x8c   : > { %v645_v25 = vmul.f32 %v2881_v39, %v2267_v13  ;;  %v744_v16 = vmul.f32 %v2889_v5, %v2272_v17  ;;  %v1061_v0 = vadd.f32 %v1029_v1, %v961_v30  ;;  %v575_v20 = vadd.f32 %v543_v8, %v475_v47 }
  0x8d   : > { %v1305_v2 = vpack.c.bf16 %v1286_v55, %v1285_v57  ;;  %v1062_v54 = vadd.f32 %v1030_v44, %v962_v59  ;;  %v576_v40 = vadd.f32 %v544_v7, %v476_v38  ;;  %v745_v62 = vmul.f32 %v2892_v31, %v2272_v17 }
  0x8e   : > { %v844_v23 = vmul.f32 %v2900_v61, %v2274_v18  ;;  %v845_v52 = vmul.f32 %v2903_v9, %v2274_v18  ;;  %v1161_v41 = vadd.f32 %v1129_v24, %v1061_v0  ;;  %v676_v44 = vadd.f32 %v644_v51, %v575_v20 }
  0x8f   : > { %2026 = vmatprep.mubr.msk.bf16.mxu1 %vm1325_vm0, %v1305_v2  ;;  %v1162_v1 = vadd.f32 %v1130_v3, %v1062_v54  ;;  %v945_v21 = vmul.f32 %v2996_v46, %v2276_v19  ;;  %v677_v22 = vadd.f32 %v645_v25, %v576_v40  ;;  %v946_v32 = vmul.f32 %v3000_v6, %v2276_v19  ;;  %v3017_v3 = vld [vmem:[%s2259_s13 + $0x16a] sm:$0xff] }
  0x90   : > { %v1045_v29 = vmul.f32 %v3005_v42, %v2284_v26  ;;  %v1046_v24 = vmul.f32 %v3008_v53, %v2284_v26  ;;  %v1200_v48 = vmul.f32 %v2432_v50, %v1161_v41  ;;  %v776_v57 = vadd.f32 %v744_v16, %v676_v44 }
  0x91   : > { %v1201_v56 = vmul.f32 %v2432_v50, %v1162_v1  ;;  %v1145_v8 = vmul.f32 %v3017_v3, %v2298_v33  ;;  %v777_v7 = vadd.f32 %v745_v62, %v677_v22  ;;  %v1146_v55 = vmul.f32 %v3022_v36, %v2298_v33 }
  0x92   : > { %v329_v30 = vmul.f32 %v2817_v43, %v2261_v10  ;;  %v330_v59 = vmul.f32 %v2823_v37, %v2261_v10  ;;  %v1239_v47 = vadd.f32 %v2446_v28, %v1200_v48  ;;  %v876_v38 = vadd.f32 %v844_v23, %v776_v57  ;;  %v3059_v48 = vld [vmem:[%s2259_s13 + $0xc8] sm:$0xff] }
  0x93   : > { %v1240_v50 = vadd.f32 %v2446_v28, %v1201_v56  ;;  %v429_v51 = vmul.f32 %v2828_v60, %v2263_v11  ;;  %v877_v25 = vadd.f32 %v845_v52, %v777_v7  ;;  %v430_v16 = vmul.f32 %v2833_v45, %v2263_v11  ;;  %v3064_v56 = vld [vmem:[%s2259_s13 + $0xc1] sm:$0xff] }
  0x94   : > { %v529_v2 = vmul.f32 %v2838_v35, %v2265_v12  ;;  %v530_v43 = vmul.f32 %v2844_v4, %v2265_v12  ;;  %v1271_v0 = vmax.f32 %v1239_v47, 0.0  ;;  %v977_v54 = vadd.f32 %v945_v21, %v876_v38  ;;  %v3053_v21 = vld [vmem:[%s2259_s13 + $0xc0] sm:$0xff] }
  0x95   : > { %v1272_v37 = vmax.f32 %v1240_v50, 0.0  ;;  %v461_v20 = vadd.f32 %v429_v51, %v329_v30  ;;  %v978_v28 = vadd.f32 %v946_v32, %v877_v25  ;;  %v462_v40 = vadd.f32 %v430_v16, %v330_v59  ;;  %v3069_v59 = vld [vmem:[%s2259_s13 + $0xc9] sm:$0xff]  ;;  %v3079_v50 = vld [vmem:[%s3443_s2] ss:$0 sm:$0xff] }
  0x96   : > { %v630_v60 = vmul.f32 %v2937_v58, %v2267_v13  ;;  %v631_v45 = vmul.f32 %v2941_v14, %v2267_v13  ;;  %v1077_v35 = vadd.f32 %v1045_v29, %v977_v54  ;;  %v730_v4 = vmul.f32 %v2946_v49, %v2272_v17  ;;  %v3074_v47 = vld [vmem:[%s2259_s13 + $0xc2] sm:$0xff]  ;;  %v3085_v25 = vld [vmem:[%s2259_s13 + $0xca] sm:$0xff]  ;;  %v3097_v54 = vld [vmem:[%s3444_s3] ss:$0 sm:$0xff] }
  0x97   : > { %v1298_v62 = vpack.c.bf16 %v1272_v37, %v1271_v0  ;;  %v561_v23 = vadd.f32 %v529_v2, %v461_v20  ;;  %v1078_v52 = vadd.f32 %v1046_v24, %v978_v28  ;;  %v562_v41 = vadd.f32 %v530_v43, %v462_v40 }
  0x98   : > { %v731_v1 = vmul.f32 %v2949_v63, %v2272_v17  ;;  %v830_v44 = vmul.f32 %v2959_v15, %v2274_v18  ;;  %v1177_v22 = vadd.f32 %v1145_v8, %v1077_v35  ;;  %v831_v29 = vmul.f32 %v2963_v27, %v2274_v18 }
  0x99   : > { %2011 = vmatmul.mubr.msk.bf16.gmra.mrb[8].mxu0 %vm1325_vm0, %v1298_v62  ;;  %v662_v32 = vadd.f32 %v630_v60, %v561_v23  ;;  %v931_v24 = vmul.f32 %v3053_v21, %v2276_v19  ;;  %v1178_v57 = vadd.f32 %v1146_v55, %v1078_v52  ;;  %v663_v7 = vadd.f32 %v631_v45, %v562_v41 }
  0x9a   : > { %v932_v30 = vmul.f32 %v3059_v48, %v2276_v19  ;;  %v1031_v8 = vmul.f32 %v3064_v56, %v2284_v26  ;;  %v1216_v38 = vmul.f32 %v3079_v50, %v1177_v22  ;;  %v1032_v55 = vmul.f32 %v3069_v59, %v2284_v26 }
  0x9b   : > { %v762_v51 = vadd.f32 %v730_v4, %v662_v32  ;;  %v1131_v16 = vmul.f32 %v3074_v47, %v2298_v33  ;;  %v1217_v2 = vmul.f32 %v3079_v50, %v1178_v57  ;;  %v763_v43 = vadd.f32 %v731_v1, %v663_v7 }
  0x9c   : > { %v1132_v0 = vmul.f32 %v3085_v25, %v2298_v33  ;;  %v345_v37 = vmul.f32 %v2878_v34, %v2261_v10  ;;  %v1255_v20 = vadd.f32 %v3097_v54, %v1216_v38  ;;  %v346_v40 = vmul.f32 %v2881_v39, %v2261_v10 }
  0x9d   : > { %v862_v28 = vadd.f32 %v830_v44, %v762_v51  ;;  %v445_v60 = vmul.f32 %v2889_v5, %v2263_v11  ;;  %v1256_v45 = vadd.f32 %v3097_v54, %v1217_v2  ;;  %v863_v62 = vadd.f32 %v831_v29, %v763_v43  ;;  %v3124_v51 = vld [vmem:[%s2259_s13 + $0x180] sm:$0xff]  ;;  %v3127_v2 = vld [vmem:[%s2259_s13 + $0x188] sm:$0xff] }
  0x9e   : > { %v446_v34 = vmul.f32 %v2892_v31, %v2263_v11  ;;  %v545_v35 = vmul.f32 %v2900_v61, %v2265_v12  ;;  %v1287_v23 = vmax.f32 %v1255_v20, 0.0  ;;  %v546_v41 = vmul.f32 %v2903_v9, %v2265_v12  ;;  %v3135_v20 = vld [vmem:[%s2259_s13 + $0x181] sm:$0xff] }
  0x9f   : > { %v963_v4 = vadd.f32 %v931_v24, %v862_v28  ;;  %v477_v52 = vadd.f32 %v445_v60, %v345_v37  ;;  %v1288_v1 = vmax.f32 %v1256_v45, 0.0  ;;  %v964_v39 = vadd.f32 %v932_v30, %v863_v62  ;;  %v3138_v28 = vld [vmem:[%s2259_s13 + $0x189] sm:$0xff] }
  0xa0   : > { %v478_v5 = vadd.f32 %v446_v34, %v346_v40  ;;  %v646_v44 = vmul.f32 %v2996_v46, %v2267_v13  ;;  %v647_v31 = vmul.f32 %v3000_v6, %v2267_v13  ;;  %v746_v61 = vmul.f32 %v3005_v42, %v2272_v17  ;;  %v3146_v62 = vld [vmem:[%s2259_s13 + $0x182] sm:$0xff]  ;;  %v3149_v34 = vld [vmem:[%s2259_s13 + $0x18a] sm:$0xff] }
  0xa1   : > { %v1063_v22 = vadd.f32 %v1031_v8, %v963_v4  ;;  %v577_v32 = vadd.f32 %v545_v35, %v477_v52  ;;  %v1306_v29 = vpack.c.bf16 %v1288_v1, %v1287_v23  ;;  %v1064_v9 = vadd.f32 %v1032_v55, %v964_v39 }
  0xa2   : > { %v578_v24 = vadd.f32 %v546_v41, %v478_v5  ;;  %v747_v57 = vmul.f32 %v3008_v53, %v2272_v17  ;;  %v846_v8 = vmul.f32 %v3017_v3, %v2274_v18  ;;  %v847_v38 = vmul.f32 %v3022_v36, %v2274_v18 }
  0xa3   : > { %v1163_v7 = vadd.f32 %v1131_v16, %v1063_v22  ;;  %v678_v30 = vadd.f32 %v646_v44, %v577_v32  ;;  %2027 = vmatmul.mubr.msk.bf16.gmra.mrb[8].mxu1 %vm1325_vm0, %v1306_v29  ;;  %v1164_v55 = vadd.f32 %v1132_v0, %v1064_v9  ;;  %v947_v16 = vmul.f32 %v3124_v51, %v2276_v19 }
  0xa4   : > { %v679_v43 = vadd.f32 %v647_v31, %v578_v24  ;;  %v948_v37 = vmul.f32 %v3127_v2, %v2276_v19  ;;  %v1047_v45 = vmul.f32 %v3135_v20, %v2284_v26  ;;  %v1048_v0 = vmul.f32 %v3138_v28, %v2284_v26 }
  0xa5   : > { %v1202_v40 = vmul.f32 %v3079_v50, %v1163_v7  ;;  %v778_v60 = vadd.f32 %v746_v61, %v678_v30  ;;  %v1203_v35 = vmul.f32 %v3079_v50, %v1164_v55  ;;  %v1147_v4 = vmul.f32 %v3146_v62, %v2298_v33 }
  0xa6   : > { %v779_v23 = vadd.f32 %v747_v57, %v679_v43  ;;  %v1148_v52 = vmul.f32 %v3149_v34, %v2298_v33  ;;  %v331_v39 = vmul.f32 %v2937_v58, %v2261_v10  ;;  %v332_v5 = vmul.f32 %v2941_v14, %v2261_v10 }
  0xa7   : > { %v1241_v41 = vadd.f32 %v3097_v54, %v1202_v40  ;;  %v878_v1 = vadd.f32 %v846_v8, %v778_v60  ;;  %v1242_v44 = vadd.f32 %v3097_v54, %v1203_v35  ;;  %v431_v32 = vmul.f32 %v2946_v49, %v2263_v11  ;;  %v1870_v8 = vld [vmem:[%s2259_s13 + $0xd8] sm:$0xff]  ;;  %v1903_v40 = vld [vmem:[%s2259_s13 + $0xe1] sm:$0xff] }
  0xa8   : > { %v879_v22 = vadd.f32 %v847_v38, %v779_v23  ;;  %v432_v31 = vmul.f32 %v2949_v63, %v2263_v11  ;;  %v531_v9 = vmul.f32 %v2959_v15, %v2265_v12  ;;  %v532_v58 = vmul.f32 %v2963_v27, %v2265_v12 }
  0xa9   : > { %v1273_v61 = vmax.f32 %v1241_v41, 0.0  ;;  %v979_v29 = vadd.f32 %v947_v16, %v878_v1  ;;  %v1274_v14 = vmax.f32 %v1242_v44, 0.0  ;;  %v463_v57 = vadd.f32 %v431_v32, %v331_v39  ;;  %v1871_v16 = vld [vmem:[%s2259_s13 + $0xe0] sm:$0xff] }
  0xaa   : > { %v980_v24 = vadd.f32 %v948_v37, %v879_v22  ;;  %v464_v7 = vadd.f32 %v432_v31, %v332_v5  ;;  %v632_v49 = vmul.f32 %v3053_v21, %v2267_v13  ;;  %v633_v63 = vmul.f32 %v3059_v48, %v2267_v13  ;;  %v1902_v37 = vld [vmem:[%s2259_s13 + $0xd9] sm:$0xff]  ;;  %v1935_v1 = vld [vmem:[%s2259_s13 + $0xe2] sm:$0xff] }
  0xab   : > { %v1079_v30 = vadd.f32 %v1047_v45, %v979_v29  ;;  %v732_v15 = vmul.f32 %v3064_v56, %v2272_v17  ;;  %v1299_v38 = vpack.c.bf16 %v1274_v14, %v1273_v61  ;;  %v563_v27 = vadd.f32 %v531_v9, %v463_v57  ;;  %v1934_v56 = vld [vmem:[%s2259_s13 + $0xda] sm:$0xff] }
  0xac   : > { %v1080_v55 = vadd.f32 %v1048_v0, %v980_v24  ;;  %v564_v43 = vadd.f32 %v532_v58, %v464_v7  ;;  %v733_v45 = vmul.f32 %v3069_v59, %v2272_v17  ;;  %v832_v21 = vmul.f32 %v3074_v47, %v2274_v18 }
  0xad   : > { %v1179_v60 = vadd.f32 %v1147_v4, %v1079_v30  ;;  %v833_v48 = vmul.f32 %v3085_v25, %v2274_v18  ;;  %2014 = vmatprep.mubr.msk.bf16.mxu0 %vm1325_vm0, %v1299_v38  ;;  %v664_v35 = vadd.f32 %v632_v49, %v563_v27  ;;  %v933_v41 = vmul.f32 %v1870_v8, %v2276_v19 }
  0xae   : > { %v1180_v0 = vadd.f32 %v1148_v52, %v1080_v55  ;;  %v665_v23 = vadd.f32 %v633_v63, %v564_v43  ;;  %v934_v39 = vmul.f32 %v1871_v16, %v2276_v19  ;;  %v1033_v59 = vmul.f32 %v1902_v37, %v2284_v26  ;;  %v1886_v55 = vld [vmem:[%s2259_s13 + $0x198] sm:$0xff] }
  0xaf   : > { %v1218_v4 = vmul.f32 %v3079_v50, %v1179_v60  ;;  %v1034_v47 = vmul.f32 %v1903_v40, %v2284_v26  ;;  %v764_v25 = vadd.f32 %v732_v15, %v664_v35  ;;  %v1133_v22 = vmul.f32 %v1934_v56, %v2298_v33  ;;  %v1918_v37 = vld [vmem:[%s2259_s13 + $0x199] sm:$0xff] }
  0xb0   : > { %v1219_v5 = vmul.f32 %v3079_v50, %v1180_v0  ;;  %v765_v44 = vadd.f32 %v733_v45, %v665_v23  ;;  %v1134_v32 = vmul.f32 %v1935_v1, %v2298_v33  ;;  %v347_v31 = vmul.f32 %v2996_v46, %v2261_v10  ;;  %v1919_v45 = vld [vmem:[%s2259_s13 + $0x1a1] sm:$0xff] }
  0xb1   : > { %v1257_v52 = vadd.f32 %v3097_v54, %v1218_v4  ;;  %v348_v61 = vmul.f32 %v3000_v6, %v2261_v10  ;;  %v864_v9 = vadd.f32 %v832_v21, %v764_v25  ;;  %v447_v14 = vmul.f32 %v3005_v42, %v2263_v11  ;;  %v1950_v56 = vld [vmem:[%s2259_s13 + $0x19a] sm:$0xff] }
  0xb2   : > { %v1258_v29 = vadd.f32 %v3097_v54, %v1219_v5  ;;  %v865_v58 = vadd.f32 %v833_v48, %v765_v44  ;;  %v448_v57 = vmul.f32 %v3008_v53, %v2263_v11  ;;  %v547_v7 = vmul.f32 %v3017_v3, %v2265_v12 }
  0xb3   : > { %v1289_v24 = vmax.f32 %v1257_v52, 0.0  ;;  %v548_v46 = vmul.f32 %v3022_v36, %v2265_v12  ;;  %v965_v10 = vadd.f32 %v933_v41, %v864_v9  ;;  %v479_v49 = vadd.f32 %v447_v14, %v347_v31 }
  0xb4   : > { %v1290_v30 = vmax.f32 %v1258_v29, 0.0  ;;  %v966_v6 = vadd.f32 %v934_v39, %v865_v58  ;;  %v480_v63 = vadd.f32 %v448_v57, %v348_v61  ;;  %v648_v42 = vmul.f32 %v3124_v51, %v2267_v13 }
  0xb5   : > { %v649_v15 = vmul.f32 %v3127_v2, %v2267_v13  ;;  %v748_v11 = vmul.f32 %v3135_v20, %v2272_v17  ;;  %v1065_v3 = vadd.f32 %v1033_v59, %v965_v10  ;;  %v579_v12 = vadd.f32 %v547_v7, %v479_v49  ;;  %v1887_v20 = vld [vmem:[%s2259_s13 + $0x1a0] sm:$0xff] }
  0xb6   : > { %v1307_v53 = vpack.c.bf16 %v1290_v30, %v1289_v24  ;;  %v1066_v8 = vadd.f32 %v1034_v47, %v966_v6  ;;  %v580_v36 = vadd.f32 %v548_v46, %v480_v63  ;;  %v749_v38 = vmul.f32 %v3138_v28, %v2272_v17 }
  0xb7   : > { %v1165_v51 = vadd.f32 %v1133_v22, %v1065_v3  ;;  %v680_v13 = vadd.f32 %v648_v42, %v579_v12  ;;  %v848_v2 = vmul.f32 %v3146_v62, %v2274_v18  ;;  %v849_v16 = vmul.f32 %v3149_v34, %v2274_v18  ;;  %v1951_v34 = vld [vmem:[%s2259_s13 + $0x1a2] sm:$0xff]  ;;  %s1758_s13 = sshll.u32 %s269_s22, 8 }
  0xb8   : > { %2030 = vmatprep.mubr.msk.bf16.mxu1 %vm1325_vm0, %v1307_v53  ;;  %v1166_v27 = vadd.f32 %v1134_v32, %v1066_v8  ;;  %v681_v43 = vadd.f32 %v649_v15, %v580_v36  ;;  %v949_v60 = vmul.f32 %v1886_v55, %v2276_v19  ;;  %v950_v48 = vmul.f32 %v1887_v20, %v2276_v19  ;;  %s3267_s14 = scalar_lea.vmem [#allocation2], %s1758_s13 }
  0xb9   : > { %v1204_v40 = vmul.f32 %v3079_v50, %v1165_v51  ;;  %v780_v28 = vadd.f32 %v748_v11, %v680_v13  ;;  %v1049_v18 = vmul.f32 %v1918_v37, %v2284_v26  ;;  %v1050_v41 = vmul.f32 %v1919_v45, %v2284_v26  ;;  %s1692_s16 = sshll.u32 %s3267_s14, 4  ;;  %s3390_s16 = int_to_ptr.vmem [resolvable:$true] %s1692_s16 }
  0xba   : > { %v1205_v17 = vmul.f32 %v3079_v50, %v1166_v27  ;;  %v781_v21 = vadd.f32 %v749_v38, %v681_v43  ;;  %v1149_v59 = vmul.f32 %v1950_v56, %v2298_v33  ;;  %v1150_v19 = vmul.f32 %v1951_v34, %v2298_v33  ;;  %v3250_v33 = vld [vmem:[%s3446_s5] ss:$0 sm:$0xff]  ;;  %s2084_s20 = scalar_lea.vmem %s3390_s16, 4096  ;;  %p2091_p0 = scmp.lt.s32.totalorder %s3390_s16, %s2089_s23 }
  0xbb   : > { %v1243_v62 = vadd.f32 %v3097_v54, %v1204_v40  ;;  %v880_v35 = vadd.f32 %v848_v2, %v780_v28  ;;  %p2085_p11 = scmp.ne.s32.totalorder %s3390_s16, %s2084_s20  ;;  %p2092_p1 = scmp.lt.s32.totalorder %s2090_s29, %s2084_s20 }
  0xbc   : > { %v1244_v0 = vadd.f32 %v3097_v54, %v1205_v17  ;;  %v881_v23 = vadd.f32 %v849_v16, %v781_v21 }
  0xbd   : > { %v1275_v1 = vmax.f32 %v1243_v62, 0.0  ;;  %v981_v39 = vadd.f32 %v949_v60, %v880_v35  ;;  %p2086_p12 = pnand %p2085_p11, %p2229_p5  ;;  %p2093_p2 = por %p2092_p1, %p2091_p0 }
  0xbe   : > { %v1276_v4 = vmax.f32 %v1244_v0, 0.0  ;;  %v982_v47 = vadd.f32 %v950_v48, %v881_v23 }
  0xbf   : > { %v1081_v25 = vadd.f32 %v1049_v18, %v981_v39  ;;  %p2087_p13 = pneg %p2086_p12 }
  0xc0   : > { %v1300_v5 = vpack.c.bf16 %v1276_v4, %v1275_v1  ;;  %v1082_v44 = vadd.f32 %v1050_v41, %v982_v47 }
  0xc1   : > { %v1181_v22 = vadd.f32 %v1149_v59, %v1081_v25  ;;  %p2094_p3 = pnand %p2093_p2, %p2087_p13 }
  0xc2   : > { %2015 = vmatmul.mubr.msk.bf16.gmra.mrb[12].mxu0 %vm1325_vm0, %v1300_v5  ;;  %v1182_v52 = vadd.f32 %v1150_v19, %v1082_v44 }
  0xc3   : > { %v1220_v32 = vmul.f32 %v3079_v50, %v1181_v22 }
  0xc4   : > { %v1221_v26 = vmul.f32 %v3079_v50, %v1182_v52  ;;  %v3255_v50 = vld [vmem:[%s3447_s6] ss:$0 sm:$0xff] }
  0xc5   : > { %v1259_v31 = vadd.f32 %v3097_v54, %v1220_v32 }
  0xc6   : > { %v1260_v61 = vadd.f32 %v3097_v54, %v1221_v26 }
  0xc7   : > { %v1291_v29 = vmax.f32 %v1259_v31, 0.0 }
  0xc8   : > { %v1292_v9 = vmax.f32 %v1260_v61, 0.0 }
  0xca   : > { %v1308_v58 = vpack.c.bf16 %v1292_v9, %v1291_v29 }
  0xcc   : > { %2031 = vmatmul.mubr.msk.bf16.gmra.mrb[12].mxu1 %vm1325_vm0, %v1308_v58 }
 0x118   : > { %v2004_v14 = vpop.f32.mrb[0].mxu0 }
 0x119   : > { %v1544_v54 = vmul.f32 %v2004_v14, %v3250_v33  ;;  %v1408_v24 = vpop.f32.mrb[1].mxu0 }
 0x11a   : > { %v1542_v57 = vmul.f32 %v3250_v33, %v1408_v24  ;;  %v2005_v7 = vpop.f32.mrb[2].mxu0 }
 0x11b   : > { %v1583_v46 = vadd.f32 %v3255_v50, %v1544_v54  ;;  %v1545_v30 = vmul.f32 %v2005_v7, %v3250_v33  ;;  %v1411_v10 = vpop.f32.mrb[3].mxu0 }
 0x11c   : > { %v1581_v6 = vadd.f32 %v3255_v50, %v1542_v57  ;;  %v1543_v49 = vmul.f32 %v3250_v33, %v1411_v10 }
 0x11d   : > { %v1615_v63 = vmax.f32 %v1583_v46, 0.0  ;;  %v1584_v42 = vadd.f32 %v3255_v50, %v1545_v30 }
 0x11e   : > { %v1613_v15 = vmax.f32 %v1581_v6, 0.0  ;;  %v1582_v11 = vadd.f32 %v3255_v50, %v1543_v49 }
 0x11f   : > { %1648 = vst.msk [vmem:[%s3267_s14 + $0x10] sm:$0xff] %vm1645_vm1, %v1615_v63  ;;  %v1616_v53 = vmax.f32 %v1584_v42, 0.0 }
 0x120   : > { %1646 = vst.msk [vmem:[%s3267_s14] sm:$0xff] %vm1645_vm1, %v1613_v15  ;;  %v1614_v3 = vmax.f32 %v1582_v11, 0.0 }
 0x121   : > { %1649 = vst.msk [vmem:[%s3267_s14 + $0x18] sm:$0xff] %vm1645_vm1, %v1616_v53 }
 0x122   : > { %1647 = vst.msk [vmem:[%s3267_s14 + $0x8] sm:$0xff] %vm1645_vm1, %v1614_v3 }
 0x125   : > { %v2020_v8 = vpop.f32.mrb[0].mxu1 }
 0x126   : > { %v1560_v12 = vmul.f32 %v2020_v8, %v3250_v33  ;;  %v1472_v36 = vpop.f32.mrb[1].mxu1 }
 0x127   : > { %v1558_v38 = vmul.f32 %v3250_v33, %v1472_v36  ;;  %v2021_v55 = vpop.f32.mrb[2].mxu1 }
 0x128   : > { %v1599_v51 = vadd.f32 %v3255_v50, %v1560_v12  ;;  %v1561_v27 = vmul.f32 %v2021_v55, %v3250_v33  ;;  %v1475_v13 = vpop.f32.mrb[3].mxu1 }
 0x129   : > { %v1597_v2 = vadd.f32 %v3255_v50, %v1558_v38  ;;  %v1559_v20 = vmul.f32 %v3250_v33, %v1475_v13 }
 0x12a   : > { %v1631_v43 = vmax.f32 %v1599_v51, 0.0  ;;  %v1600_v16 = vadd.f32 %v3255_v50, %v1561_v27 }
 0x12b   : > { %v1629_v37 = vmax.f32 %v1597_v2, 0.0  ;;  %v1598_v40 = vadd.f32 %v3255_v50, %v1559_v20 }
 0x12c   : > { %1664 = vst.msk [vmem:[%s3267_s14 + $0x90] sm:$0xff] %vm1645_vm1, %v1631_v43  ;;  %v1632_v17 = vmax.f32 %v1600_v16, 0.0 }
 0x12d   : > { %1662 = vst.msk [vmem:[%s3267_s14 + $0x80] sm:$0xff] %vm1645_vm1, %v1629_v37  ;;  %v1630_v28 = vmax.f32 %v1598_v40, 0.0 }
 0x12e   : > { %1665 = vst.msk [vmem:[%s3267_s14 + $0x98] sm:$0xff] %vm1645_vm1, %v1632_v17 }
 0x12f   : > { %1663 = vst.msk [vmem:[%s3267_s14 + $0x88] sm:$0xff] %vm1645_vm1, %v1630_v28 }
 0x143   : > { %v2008_v60 = vpop.f32.mrb[4].mxu0 }
 0x144   : > { %v1548_v45 = vmul.f32 %v2008_v60, %v3250_v33  ;;  %v1424_v21 = vpop.f32.mrb[5].mxu0 }
 0x145   : > { %v1546_v48 = vmul.f32 %v3250_v33, %v1424_v21  ;;  %v2009_v56 = vpop.f32.mrb[6].mxu0 }
 0x146   : > { %v1587_v62 = vadd.f32 %v3255_v50, %v1548_v45  ;;  %v1549_v0 = vmul.f32 %v2009_v56, %v3250_v33  ;;  %v1427_v35 = vpop.f32.mrb[7].mxu0 }
 0x147   : > { %v1585_v18 = vadd.f32 %v3255_v50, %v1546_v48  ;;  %v1547_v34 = vmul.f32 %v3250_v33, %v1427_v35 }
 0x148   : > { %v1619_v23 = vmax.f32 %v1587_v62, 0.0  ;;  %v1588_v41 = vadd.f32 %v3255_v50, %v1549_v0 }
 0x149   : > { %v1617_v1 = vmax.f32 %v1585_v18, 0.0  ;;  %v1586_v4 = vadd.f32 %v3255_v50, %v1547_v34 }
 0x14a   : > { %1652 = vst.msk [vmem:[%s3267_s14 + $0x30] sm:$0xff] %vm1645_vm1, %v1619_v23  ;;  %v1620_v39 = vmax.f32 %v1588_v41, 0.0 }
 0x14b   : > { %1650 = vst.msk [vmem:[%s3267_s14 + $0x20] sm:$0xff] %vm1645_vm1, %v1617_v1  ;;  %v1618_v59 = vmax.f32 %v1586_v4, 0.0 }
 0x14c   : > { %1653 = vst.msk [vmem:[%s3267_s14 + $0x38] sm:$0xff] %vm1645_vm1, %v1620_v39 }
 0x14d   : > { %1651 = vst.msk [vmem:[%s3267_s14 + $0x28] sm:$0xff] %vm1645_vm1, %v1618_v59  ;;  %v2024_v47 = vpop.f32.mrb[4].mxu1 }
 0x14e   : > { %v1564_v19 = vmul.f32 %v2024_v47, %v3250_v33  ;;  %v1488_v5 = vpop.f32.mrb[5].mxu1 }
 0x14f   : > { %v1562_v25 = vmul.f32 %v3250_v33, %v1488_v5  ;;  %v2025_v44 = vpop.f32.mrb[6].mxu1 }
 0x150   : > { %v1603_v22 = vadd.f32 %v3255_v50, %v1564_v19  ;;  %v1565_v52 = vmul.f32 %v2025_v44, %v3250_v33  ;;  %v1491_v32 = vpop.f32.mrb[7].mxu1 }
 0x151   : > { %v1601_v26 = vadd.f32 %v3255_v50, %v1562_v25  ;;  %v1563_v31 = vmul.f32 %v3250_v33, %v1491_v32 }
 0x152   : > { %v1635_v61 = vmax.f32 %v1603_v22, 0.0  ;;  %v1604_v29 = vadd.f32 %v3255_v50, %v1565_v52 }
 0x153   : > { %v1633_v9 = vmax.f32 %v1601_v26, 0.0  ;;  %v1602_v58 = vadd.f32 %v3255_v50, %v1563_v31 }
 0x154   : > { %1668 = vst.msk [vmem:[%s3267_s14 + $0xb0] sm:$0xff] %vm1645_vm1, %v1635_v61  ;;  %v1636_v14 = vmax.f32 %v1604_v29, 0.0 }
 0x155   : > { %1666 = vst.msk [vmem:[%s3267_s14 + $0xa0] sm:$0xff] %vm1645_vm1, %v1633_v9  ;;  %v1634_v54 = vmax.f32 %v1602_v58, 0.0 }
 0x156   : > { %1669 = vst.msk [vmem:[%s3267_s14 + $0xb8] sm:$0xff] %vm1645_vm1, %v1636_v14 }
 0x157   : > { %1667 = vst.msk [vmem:[%s3267_s14 + $0xa8] sm:$0xff] %vm1645_vm1, %v1634_v54 }
 0x16c   : > { %v2012_v24 = vpop.f32.mrb[8].mxu0 }
 0x16d   : > { %v1552_v57 = vmul.f32 %v2012_v24, %v3250_v33  ;;  %v1440_v7 = vpop.f32.mrb[9].mxu0 }
 0x16e   : > { %v1550_v46 = vmul.f32 %v3250_v33, %v1440_v7  ;;  %v2013_v30 = vpop.f32.mrb[10].mxu0 }
 0x16f   : > { %v1591_v10 = vadd.f32 %v3255_v50, %v1552_v57  ;;  %v1553_v6 = vmul.f32 %v2013_v30, %v3250_v33  ;;  %v1443_v49 = vpop.f32.mrb[11].mxu0 }
 0x170   : > { %v1589_v63 = vadd.f32 %v3255_v50, %v1550_v46  ;;  %v1551_v42 = vmul.f32 %v3250_v33, %v1443_v49 }
 0x171   : > { %v1623_v15 = vmax.f32 %v1591_v10, 0.0  ;;  %v1592_v11 = vadd.f32 %v3255_v50, %v1553_v6 }
 0x172   : > { %v1621_v53 = vmax.f32 %v1589_v63, 0.0  ;;  %v1590_v3 = vadd.f32 %v3255_v50, %v1551_v42 }
 0x173   : > { %1656 = vst.msk [vmem:[%s3267_s14 + $0x50] sm:$0xff] %vm1645_vm1, %v1623_v15  ;;  %v1624_v8 = vmax.f32 %v1592_v11, 0.0 }
 0x174   : > { %1654 = vst.msk [vmem:[%s3267_s14 + $0x40] sm:$0xff] %vm1645_vm1, %v1621_v53  ;;  %v1622_v12 = vmax.f32 %v1590_v3, 0.0 }
 0x175   : > { %1657 = vst.msk [vmem:[%s3267_s14 + $0x58] sm:$0xff] %vm1645_vm1, %v1624_v8 }
 0x176   : > { %1655 = vst.msk [vmem:[%s3267_s14 + $0x48] sm:$0xff] %vm1645_vm1, %v1622_v12  ;;  %v2028_v36 = vpop.f32.mrb[8].mxu1 }
 0x177   : > { %v1568_v38 = vmul.f32 %v2028_v36, %v3250_v33  ;;  %v1504_v55 = vpop.f32.mrb[9].mxu1 }
 0x178   : > { %v1566_v51 = vmul.f32 %v3250_v33, %v1504_v55  ;;  %v2029_v27 = vpop.f32.mrb[10].mxu1 }
 0x179   : > { %v1607_v13 = vadd.f32 %v3255_v50, %v1568_v38  ;;  %v1569_v2 = vmul.f32 %v2029_v27, %v3250_v33  ;;  %v1507_v20 = vpop.f32.mrb[11].mxu1 }
 0x17a   : > { %v1605_v43 = vadd.f32 %v3255_v50, %v1566_v51  ;;  %v1567_v16 = vmul.f32 %v3250_v33, %v1507_v20 }
 0x17b   : > { %v1639_v37 = vmax.f32 %v1607_v13, 0.0  ;;  %v1608_v40 = vadd.f32 %v3255_v50, %v1569_v2 }
 0x17c   : > { %v1637_v17 = vmax.f32 %v1605_v43, 0.0  ;;  %v1606_v28 = vadd.f32 %v3255_v50, %v1567_v16 }
 0x17d   : > { %1672 = vst.msk [vmem:[%s3267_s14 + $0xd0] sm:$0xff] %vm1645_vm1, %v1639_v37  ;;  %v1640_v60 = vmax.f32 %v1608_v40, 0.0 }
 0x17e   : > { %1670 = vst.msk [vmem:[%s3267_s14 + $0xc0] sm:$0xff] %vm1645_vm1, %v1637_v17  ;;  %v1638_v45 = vmax.f32 %v1606_v28, 0.0 }
 0x17f   : > { %1673 = vst.msk [vmem:[%s3267_s14 + $0xd8] sm:$0xff] %vm1645_vm1, %v1640_v60 }
 0x180   : > { %1671 = vst.msk [vmem:[%s3267_s14 + $0xc8] sm:$0xff] %vm1645_vm1, %v1638_v45 }
 0x195   : > { %v2016_v21 = vpop.f32.mrb[12].mxu0 }
 0x196   : > { %v1556_v48 = vmul.f32 %v2016_v21, %v3250_v33  ;;  %v1456_v56 = vpop.f32.mrb[13].mxu0 }
 0x197   : > { %v1554_v62 = vmul.f32 %v3250_v33, %v1456_v56  ;;  %v2017_v0 = vpop.f32.mrb[14].mxu0 }
 0x198   : > { %v1595_v35 = vadd.f32 %v3255_v50, %v1556_v48  ;;  %v1557_v18 = vmul.f32 %v2017_v0, %v3250_v33  ;;  %v1459_v34 = vpop.f32.mrb[15].mxu0 }
 0x199   : > { %v1593_v23 = vadd.f32 %v3255_v50, %v1554_v62  ;;  %v1555_v41 = vmul.f32 %v3250_v33, %v1459_v34 }
 0x19a   : > { %v1627_v1 = vmax.f32 %v1595_v35, 0.0  ;;  %v1596_v4 = vadd.f32 %v3255_v50, %v1557_v18 }
 0x19b   : > { %v1625_v39 = vmax.f32 %v1593_v23, 0.0  ;;  %v1594_v59 = vadd.f32 %v3255_v50, %v1555_v41 }
 0x19c   : > { %1660 = vst.msk [vmem:[%s3267_s14 + $0x70] sm:$0xff] %vm1645_vm1, %v1627_v1  ;;  %v1628_v47 = vmax.f32 %v1596_v4, 0.0 }
 0x19d   : > { %1658 = vst.msk [vmem:[%s3267_s14 + $0x60] sm:$0xff] %vm1645_vm1, %v1625_v39  ;;  %v1626_v19 = vmax.f32 %v1594_v59, 0.0 }
 0x19e   : > { %1661 = vst.msk [vmem:[%s3267_s14 + $0x78] sm:$0xff] %vm1645_vm1, %v1628_v47 }
 0x19f   : > { %1659 = vst.msk [vmem:[%s3267_s14 + $0x68] sm:$0xff] %vm1645_vm1, %v1626_v19  ;;  %v2032_v5 = vpop.f32.mrb[12].mxu1 }
 0x1a0   : > { %v1572_v25 = vmul.f32 %v2032_v5, %v3250_v33  ;;  %v1520_v44 = vpop.f32.mrb[13].mxu1 }
 0x1a1   : > { %v1570_v22 = vmul.f32 %v3250_v33, %v1520_v44  ;;  %v2033_v52 = vpop.f32.mrb[14].mxu1 }
 0x1a2   : > { %v1611_v32 = vadd.f32 %v3255_v50, %v1572_v25  ;;  %v1573_v26 = vmul.f32 %v2033_v52, %v3250_v33  ;;  %v1523_v31 = vpop.f32.mrb[15].mxu1 }
 0x1a3   : > { %v1609_v61 = vadd.f32 %v3255_v50, %v1570_v22  ;;  %v1571_v29 = vmul.f32 %v3250_v33, %v1523_v31 }
 0x1a4   : > { %v1643_v9 = vmax.f32 %v1611_v32, 0.0  ;;  %v1612_v58 = vadd.f32 %v3255_v50, %v1573_v26 }
 0x1a5   : > { %v1641_v14 = vmax.f32 %v1609_v61, 0.0  ;;  %v1610_v54 = vadd.f32 %v3255_v50, %v1571_v29 }
 0x1a6   : > { %1676 = vst.msk [vmem:[%s3267_s14 + $0xf0] sm:$0xff] %vm1645_vm1, %v1643_v9  ;;  %v1644_v24 = vmax.f32 %v1612_v58, 0.0 }
 0x1a7   : > { %1674 = vst.msk [vmem:[%s3267_s14 + $0xe0] sm:$0xff] %vm1645_vm1, %v1641_v14  ;;  %v1642_v33 = vmax.f32 %v1610_v54, 0.0 }
 0x1a8   : > { %1677 = vst.msk [vmem:[%s3267_s14 + $0xf8] sm:$0xff] %vm1645_vm1, %v1644_v24 }
 0x1a9   : > { %1675 = vst.msk [vmem:[%s3267_s14 + $0xe8] sm:$0xff] %vm1645_vm1, %v1642_v33 }
 0x1aa   : > { %2097 = shalt.err (!%p2094_p3)
}
 0x1ab   : > { %s2098_s22 = scalar_lea.hbm %s3388_s19, 4096  ;;  %s2102_s13 = scalar_lea.hbm %s3448_s7, 16384 }
 0x1ac   : > { %p2099_p4 = scmp.ne.s32.totalorder %s3388_s19, %s2098_s22  ;;  %p2103_p9 = scmp.lt.u32.totalorder %s3388_s19, %s3448_s7 }
 0x1ad   : > { %p2104_p10 = scmp.lt.u32.totalorder %s2102_s13, %s2098_s22  ;;  %p2106_p12 = scmp.lt.u32.totalorder %s2098_s22, %s3388_s19 }
 0x1ae   : > { %p2100_p7 = pnand %p2099_p4, %p2229_p5 }
 0x1af   : > { %p2105_p11 = por %p2104_p10, %p2103_p9 }
 0x1b0   : > { %p2101_p8 = pneg %p2100_p7 }
 0x1b1   : > { %p2107_p13 = por %p2106_p12, %p2105_p11 }
 0x1b3   : > { %p2108_p0 = pnand %p2107_p13, %p2101_p8 }
 0x1b5   : > { %2111 = shalt.err (!%p2108_p0)
}
 0x1b6   : > { %s2149_s17 = smov 128   ;;  %s2150_s18 = smov 8  }
 0x1b7   : > { %2039 = dma.vmem_to_hbm [thread:$0]  (%p2229_p5), %s3390_s16, 4096, %s3388_s19, %s3400_s28, %s2149_s17, %s2149_s17, %s2150_s18  }
 0x1b8 PF: > { %p2045_p1 = scmp.ge.s32.totalorder %s2146_s27, 2  ;;  %s1707_s20 = sand.u32 1, %s2134_s24  }
 0x1b9   : > { %s1708_s21 = scalar_lea.sflag [#allocation3], %s1707_s20 }
 0x1ba   : > { %p2042_p2 = pnand %p2045_p1, %p2233_p6 }
 0x1bc   : > { %2129 = dma.done.wait (!%p2042_p2), %s1708_s21, 4096  }
 0x1bd   : > { %2131 = vsyncadd (!%p2042_p2), %s1708_s21, 4294963200  ;;  %p17_p3 = scmp.ge.s32.totalorder %s2216_s30, 6   ;;  %s3451_s24 = smov %s2138_s25 }
 0x1be   : > { %s3452_s25 = smov %s2142_s26  ;;  %s3453_s26 = smov %s2227_s10 }
 0x1bf   : > { %s3454_s27 = smov %s2216_s30  ;;  %19 = sbr.rel (!%p17_p3) target bundleno = 3 (0x3), region = 85 }
 0x1c6   :  { %1713 = vsyncpa [#allocation3], 1 }
 0x1c7   :  { %1715 = vsyncpa [#allocation3 + $0x1], 1 }

</bundles_post_ra>
